<compile_context>
chip_gen: v6e
topology: v6e:2x2x1
jax: 0.10.0
libtpu: 0.0.40
codegen_flags: <defaults>
</compile_context>

<pallas_src>
import numpy as np
import jax
import jax.numpy as jnp
from jax.experimental import pallas as pl
from jax.experimental.pallas import tpu as pltpu

IN_CHANNELS = 3
STEM_CHANNELS = (16, 32, 32)
LOCAL_CHANNELS = (128, 128)
SEG_CHANNELS = (64, 64, 32)
SEG_IN_CHANNELS = sum(STEM_CHANNELS) + sum(LOCAL_CHANNELS) + LOCAL_CHANNELS[-1]  # 464
BN_EPS = 1e-5


# ------------------------------------------------------------------ params --
def init_params(key):
    """Xavier-uniform conv weights, (C_out, C_in) orientation, eval-mode BN
    folded in (scale only; the folded biases are exactly zero and dropped),
    stored in bf16 for the MXU."""
    sizes = [
        (STEM_CHANNELS[0], IN_CHANNELS),
        (STEM_CHANNELS[1], STEM_CHANNELS[0]),
        (STEM_CHANNELS[2], STEM_CHANNELS[1]),
        (LOCAL_CHANNELS[0], STEM_CHANNELS[2]),
        (LOCAL_CHANNELS[1], LOCAL_CHANNELS[0]),
        (SEG_CHANNELS[0], SEG_IN_CHANNELS),      # first seg conv (split below)
        (SEG_CHANNELS[1], SEG_CHANNELS[0]),
        (SEG_CHANNELS[2], SEG_CHANNELS[1]),      # conv_seg
    ]
    keys = jax.random.split(key, len(sizes))
    bn_scale = 1.0 / np.sqrt(1.0 + BN_EPS)       # gamma/sqrt(var+eps), defaults
    mats = []
    for k, (co, ci) in zip(keys, sizes):
        limit = float(np.sqrt(6.0 / (ci + co)))
        w = jax.random.uniform(k, (co, ci), jnp.float32, -limit, limit) * bn_scale
        mats.append(w.astype(jnp.bfloat16))
    w0, w1, w2, w3, w4, w5, w6, w7 = mats

    # Pre-split the concat-conv weight over [h1, h2, h3, l1, l2, global] blocks
    # (exactly the same initialization; avoids in-kernel lane slicing).
    splits = np.cumsum([STEM_CHANNELS[0], STEM_CHANNELS[1], STEM_CHANNELS[2],
                        LOCAL_CHANNELS[0], LOCAL_CHANNELS[1]]).tolist()
    w5h1, w5h2, w5h3, w5l1, w5l2, w5g = jnp.split(w5, splits, axis=1)
    return (w0, w1, w2, w3, w4, w5h1, w5h2, w5h3, w5l1, w5l2, w5g, w6, w7)


# ------------------------------------------------------------------ kernel --
def _fc_relu(w_ref, h):
    """(C_out, C_in) @ (C_in, N) on the MXU (bf16 inputs, f32 acc) + ReLU."""
    y = jnp.dot(w_ref[...], h.astype(jnp.bfloat16),
                preferred_element_type=jnp.float32)
    return jnp.maximum(y, 0.0)


def pointnet_kernel(x_ref,
                    w0, w1, w2, w3, w4,
                    w5h1, w5h2, w5h3, w5l1, w5l2, w5g,
                    w6, w7,
                    out_ref):
    x = x_ref[0]                                    # (3, N) f32, dense sublanes

    # Stem SharedMLP (Conv1d 1x1 + BN + ReLU), keep per-layer features.
    h1 = _fc_relu(w0, x)                            # (16, N)
    h2 = _fc_relu(w1, h1)                           # (32, N)
    h3 = _fc_relu(w2, h2)                           # (32, N)

    # Local SharedMLP.
    l1 = _fc_relu(w3, h3)                           # (128, N)
    l2 = _fc_relu(w4, l1)                           # (128, N)

    # Global max-pool over points (lane-axis reduce on the XLU).
    g = jnp.max(l2, axis=1, keepdims=True)          # (128, 1)

    # torch.cat([stem..., local..., global_expand], dim=1) -> first seg conv,
    # as a split matmul over the pre-split weight blocks.  The global branch
    # uses the exact identity  W_g @ broadcast(g) == broadcast(W_g @ g),
    # so the (128, N) expanded global feature is never materialized.
    bf16 = jnp.bfloat16
    f32 = jnp.float32
    acc = jnp.dot(w5h1[...], h1.astype(bf16), preferred_element_type=f32)
    acc = acc + jnp.dot(w5h2[...], h2.astype(bf16), preferred_element_type=f32)
    acc = acc + jnp.dot(w5h3[...], h3.astype(bf16), preferred_element_type=f32)
    acc = acc + jnp.dot(w5l1[...], l1.astype(bf16), preferred_element_type=f32)
    acc = acc + jnp.dot(w5l2[...], l2.astype(bf16), preferred_element_type=f32)
    gcol = jnp.dot(w5g[...], g.astype(bf16), preferred_element_type=f32)  # (64, 1)
    s1 = jnp.maximum(acc + gcol, 0.0)               # (64, N), lane-broadcast add

    # Seg MLP (dropout == identity at inference) and final conv_seg.
    s2 = _fc_relu(w6, s1)                           # (64, N)
    out_ref[0] = _fc_relu(w7, s2)                   # (32, N) lane-dense store


# ----------------------------------------------------------------- wrapper --
def pointnet_forward(points, params):
    """points: (B, C_in, N)  ->  preds['feature']: (B, seg_channels[-1], N)"""
    B, C_in, N = points.shape
    x = points.astype(jnp.float32)

    in_specs = [pl.BlockSpec((1, C_in, N), lambda b: (b, 0, 0))]
    for w in params:
        in_specs.append(pl.BlockSpec(w.shape, lambda b: (0, 0)))
    out_spec = pl.BlockSpec((1, SEG_CHANNELS[-1], N), lambda b: (b, 0, 0))

    out = pl.pallas_call(
        pointnet_kernel,
        out_shape=jax.ShapeDtypeStruct((B, SEG_CHANNELS[-1], N), jnp.float32),
        grid_spec=pltpu.PrefetchScalarGridSpec(
            num_scalar_prefetch=0,
            grid=(B,),
            in_specs=in_specs,
            out_specs=out_spec),
        compiler_params=pltpu.CompilerParams(
            dimension_semantics=("parallel",),        # B>=2 -> both v7x TCs busy
            vmem_limit_bytes=32 * 1024 * 1024),
    )(x, *params)
    return {"feature": out}


# --------------------------------------------------------------- reference --
def pointnet_ref(points, params):
    """Pure-JAX reference of the original module (explicit concat + expanded
    global feature), mirroring the bf16-at-MXU-input precision."""
    (w0, w1, w2, w3, w4, w5h1, w5h2, w5h3, w5l1, w5l2, w5g, w6, w7) = params
    w5 = jnp.concatenate([w5h1, w5h2, w5h3, w5l1, w5l2, w5g], axis=1)

    def fc(w, h):
        return jnp.maximum(jnp.dot(w, h.astype(jnp.bfloat16),
                                   preferred_element_type=jnp.float32), 0.0)

    def single(x):                                   # x: (C_in, N)
        h1 = fc(w0, x); h2 = fc(w1, h1); h3 = fc(w2, h2)
        l1 = fc(w3, h3); l2 = fc(w4, l1)
        g = jnp.max(l2, axis=1, keepdims=True)
        gexp = jnp.broadcast_to(g, l2.shape)
        cat = jnp.concatenate([h1, h2, h3, l1, l2, gexp], axis=0)
        s1 = fc(w5, cat); s2 = fc(w6, s1)
        return fc(w7, s2)

    return jax.vmap(single)(points.astype(jnp.float32))


# -------------------------------------------------------------------- main --
if __name__ == "__main__":
    key = jax.random.PRNGKey(0)
    k_param, k_pts = jax.random.split(key)

    B, N = 2, 256            # B >= 2 (both v7x cores), N % 128 == 0 (lane-dense)
    params = init_params(k_param)
    points = jax.random.normal(k_pts, (B, IN_CHANNELS, N), jnp.float32)

    preds = pointnet_forward(points, params)
    feat = jax.block_until_ready(preds["feature"])
    assert feat.shape == (B, SEG_CHANNELS[-1], N), feat.shape

    ref = jax.block_until_ready(pointnet_ref(points, params))
    np.testing.assert_allclose(np.asarray(feat), np.asarray(ref),
                               rtol=1e-2, atol=1e-2)
    print("KERNEL_OK")
</pallas_src>

<mosaic_0001>
module attributes {stable_mosaic.version = 11 : i64} {
  func.func @pointnet_kernel(%arg0: i32, %arg1: memref<1x3x256xf32, #tpu.memory_space<vmem>>, %arg2: memref<16x3xbf16, #tpu.memory_space<vmem>>, %arg3: memref<32x16xbf16, #tpu.memory_space<vmem>>, %arg4: memref<32x32xbf16, #tpu.memory_space<vmem>>, %arg5: memref<128x32xbf16, #tpu.memory_space<vmem>>, %arg6: memref<128x128xbf16, #tpu.memory_space<vmem>>, %arg7: memref<64x16xbf16, #tpu.memory_space<vmem>>, %arg8: memref<64x32xbf16, #tpu.memory_space<vmem>>, %arg9: memref<64x32xbf16, #tpu.memory_space<vmem>>, %arg10: memref<64x128xbf16, #tpu.memory_space<vmem>>, %arg11: memref<64x128xbf16, #tpu.memory_space<vmem>>, %arg12: memref<64x128xbf16, #tpu.memory_space<vmem>>, %arg13: memref<64x64xbf16, #tpu.memory_space<vmem>>, %arg14: memref<32x64xbf16, #tpu.memory_space<vmem>>, %arg15: memref<1x32x256xf32, #tpu.memory_space<vmem>>) attributes {dimension_semantics = [#tpu.dimension_semantics<parallel>], iteration_bounds = array<i64: 2>, scalar_prefetch = 0 : i64, scratch_operands = 0 : i64, tpu.core_type = #tpu.core_type<tc>, window_params = [{transform_indices = @transform_0, window_bounds = array<i64: 1, 3, 256>}, {pipeline_mode = #tpu.pipeline_mode<synchronous>, transform_indices = @transform_1, window_bounds = array<i64: 16, 3>}, {pipeline_mode = #tpu.pipeline_mode<synchronous>, transform_indices = @transform_2, window_bounds = array<i64: 32, 16>}, {pipeline_mode = #tpu.pipeline_mode<synchronous>, transform_indices = @transform_3, window_bounds = array<i64: 32, 32>}, {pipeline_mode = #tpu.pipeline_mode<synchronous>, transform_indices = @transform_4, window_bounds = array<i64: 128, 32>}, {pipeline_mode = #tpu.pipeline_mode<synchronous>, transform_indices = @transform_5, window_bounds = array<i64: 128, 128>}, {pipeline_mode = #tpu.pipeline_mode<synchronous>, transform_indices = @transform_6, window_bounds = array<i64: 64, 16>}, {pipeline_mode = #tpu.pipeline_mode<synchronous>, transform_indices = @transform_7, window_bounds = array<i64: 64, 32>}, {pipeline_mode = #tpu.pipeline_mode<synchronous>, transform_indices = @transform_8, window_bounds = array<i64: 64, 32>}, {pipeline_mode = #tpu.pipeline_mode<synchronous>, transform_indices = @transform_9, window_bounds = array<i64: 64, 128>}, {pipeline_mode = #tpu.pipeline_mode<synchronous>, transform_indices = @transform_10, window_bounds = array<i64: 64, 128>}, {pipeline_mode = #tpu.pipeline_mode<synchronous>, transform_indices = @transform_11, window_bounds = array<i64: 64, 128>}, {pipeline_mode = #tpu.pipeline_mode<synchronous>, transform_indices = @transform_12, window_bounds = array<i64: 64, 64>}, {pipeline_mode = #tpu.pipeline_mode<synchronous>, transform_indices = @transform_13, window_bounds = array<i64: 32, 64>}, {transform_indices = @transform_14, window_bounds = array<i64: 1, 32, 256>}]} {
    %c0 = arith.constant 0 : index
    %c0_0 = arith.constant 0 : index
    %c0_1 = arith.constant 0 : index
    %0 = vector.load %arg1[%c0, %c0_0, %c0_1] : memref<1x3x256xf32, #tpu.memory_space<vmem>>, vector<1x3x256xf32>
    %1 = vector.shape_cast %0 : vector<1x3x256xf32> to vector<3x256xf32>
    %c0_2 = arith.constant 0 : index
    %c0_3 = arith.constant 0 : index
    %2 = vector.load %arg2[%c0_2, %c0_3] : memref<16x3xbf16, #tpu.memory_space<vmem>>, vector<16x3xbf16>
    %3 = arith.truncf %1 : vector<3x256xf32> to vector<3x256xbf16>
    %cst = arith.constant dense<0.000000e+00> : vector<16x256xf32>
    %4 = tpu.matmul %2, %3, %cst {dimension_numbers = #tpu.dot_dimension_numbers<[1], [0], [0], [1], [0, 0, 1, 1], [], []>} : vector<16x3xbf16>, vector<3x256xbf16>, vector<16x256xf32> -> vector<16x256xf32>
    %cst_4 = arith.constant 0.000000e+00 : f32
    %5 = vector.broadcast %cst_4 : f32 to vector<16x256xf32>
    %6 = arith.maximumf %4, %5 : vector<16x256xf32>
    %c0_5 = arith.constant 0 : index
    %c0_6 = arith.constant 0 : index
    %7 = vector.load %arg3[%c0_5, %c0_6] : memref<32x16xbf16, #tpu.memory_space<vmem>>, vector<32x16xbf16>
    %8 = arith.truncf %6 : vector<16x256xf32> to vector<16x256xbf16>
    %cst_7 = arith.constant dense<0.000000e+00> : vector<32x256xf32>
    %9 = tpu.matmul %7, %8, %cst_7 {dimension_numbers = #tpu.dot_dimension_numbers<[1], [0], [0], [1], [0, 0, 1, 1], [], []>} : vector<32x16xbf16>, vector<16x256xbf16>, vector<32x256xf32> -> vector<32x256xf32>
    %cst_8 = arith.constant 0.000000e+00 : f32
    %10 = vector.broadcast %cst_8 : f32 to vector<32x256xf32>
    %11 = arith.maximumf %9, %10 : vector<32x256xf32>
    %c0_9 = arith.constant 0 : index
    %c0_10 = arith.constant 0 : index
    %12 = vector.load %arg4[%c0_9, %c0_10] : memref<32x32xbf16, #tpu.memory_space<vmem>>, vector<32x32xbf16>
    %13 = arith.truncf %11 : vector<32x256xf32> to vector<32x256xbf16>
    %cst_11 = arith.constant dense<0.000000e+00> : vector<32x256xf32>
    %14 = tpu.matmul %12, %13, %cst_11 {dimension_numbers = #tpu.dot_dimension_numbers<[1], [0], [0], [1], [0, 0, 1, 1], [], []>} : vector<32x32xbf16>, vector<32x256xbf16>, vector<32x256xf32> -> vector<32x256xf32>
    %cst_12 = arith.constant 0.000000e+00 : f32
    %15 = vector.broadcast %cst_12 : f32 to vector<32x256xf32>
    %16 = arith.maximumf %14, %15 : vector<32x256xf32>
    %c0_13 = arith.constant 0 : index
    %c0_14 = arith.constant 0 : index
    %17 = vector.load %arg5[%c0_13, %c0_14] : memref<128x32xbf16, #tpu.memory_space<vmem>>, vector<128x32xbf16>
    %18 = arith.truncf %16 : vector<32x256xf32> to vector<32x256xbf16>
    %cst_15 = arith.constant dense<0.000000e+00> : vector<128x256xf32>
    %19 = tpu.matmul %17, %18, %cst_15 {dimension_numbers = #tpu.dot_dimension_numbers<[1], [0], [0], [1], [0, 0, 1, 1], [], []>} : vector<128x32xbf16>, vector<32x256xbf16>, vector<128x256xf32> -> vector<128x256xf32>
    %cst_16 = arith.constant 0.000000e+00 : f32
    %20 = vector.broadcast %cst_16 : f32 to vector<128x256xf32>
    %21 = arith.maximumf %19, %20 : vector<128x256xf32>
    %c0_17 = arith.constant 0 : index
    %c0_18 = arith.constant 0 : index
    %22 = vector.load %arg6[%c0_17, %c0_18] : memref<128x128xbf16, #tpu.memory_space<vmem>>, vector<128x128xbf16>
    %23 = arith.truncf %21 : vector<128x256xf32> to vector<128x256xbf16>
    %cst_19 = arith.constant dense<0.000000e+00> : vector<128x256xf32>
    %24 = tpu.matmul %22, %23, %cst_19 {dimension_numbers = #tpu.dot_dimension_numbers<[1], [0], [0], [1], [0, 0, 1, 1], [], []>} : vector<128x128xbf16>, vector<128x256xbf16>, vector<128x256xf32> -> vector<128x256xf32>
    %cst_20 = arith.constant 0.000000e+00 : f32
    %25 = vector.broadcast %cst_20 : f32 to vector<128x256xf32>
    %26 = arith.maximumf %24, %25 : vector<128x256xf32>
    %cst_21 = arith.constant dense<0xFF800000> : vector<128xf32>
    %27 = vector.multi_reduction <maximumf>, %26, %cst_21 [1] : vector<128x256xf32> to vector<128xf32>
    %28 = vector.shape_cast %27 : vector<128xf32> to vector<128x1xf32>
    %c0_22 = arith.constant 0 : index
    %c0_23 = arith.constant 0 : index
    %29 = vector.load %arg7[%c0_22, %c0_23] : memref<64x16xbf16, #tpu.memory_space<vmem>>, vector<64x16xbf16>
    %30 = arith.truncf %6 : vector<16x256xf32> to vector<16x256xbf16>
    %cst_24 = arith.constant dense<0.000000e+00> : vector<64x256xf32>
    %31 = tpu.matmul %29, %30, %cst_24 {dimension_numbers = #tpu.dot_dimension_numbers<[1], [0], [0], [1], [0, 0, 1, 1], [], []>} : vector<64x16xbf16>, vector<16x256xbf16>, vector<64x256xf32> -> vector<64x256xf32>
    %c0_25 = arith.constant 0 : index
    %c0_26 = arith.constant 0 : index
    %32 = vector.load %arg8[%c0_25, %c0_26] : memref<64x32xbf16, #tpu.memory_space<vmem>>, vector<64x32xbf16>
    %33 = arith.truncf %11 : vector<32x256xf32> to vector<32x256xbf16>
    %cst_27 = arith.constant dense<0.000000e+00> : vector<64x256xf32>
    %34 = tpu.matmul %32, %33, %cst_27 {dimension_numbers = #tpu.dot_dimension_numbers<[1], [0], [0], [1], [0, 0, 1, 1], [], []>} : vector<64x32xbf16>, vector<32x256xbf16>, vector<64x256xf32> -> vector<64x256xf32>
    %35 = arith.addf %31, %34 : vector<64x256xf32>
    %c0_28 = arith.constant 0 : index
    %c0_29 = arith.constant 0 : index
    %36 = vector.load %arg9[%c0_28, %c0_29] : memref<64x32xbf16, #tpu.memory_space<vmem>>, vector<64x32xbf16>
    %37 = arith.truncf %16 : vector<32x256xf32> to vector<32x256xbf16>
    %cst_30 = arith.constant dense<0.000000e+00> : vector<64x256xf32>
    %38 = tpu.matmul %36, %37, %cst_30 {dimension_numbers = #tpu.dot_dimension_numbers<[1], [0], [0], [1], [0, 0, 1, 1], [], []>} : vector<64x32xbf16>, vector<32x256xbf16>, vector<64x256xf32> -> vector<64x256xf32>
    %39 = arith.addf %35, %38 : vector<64x256xf32>
    %c0_31 = arith.constant 0 : index
    %c0_32 = arith.constant 0 : index
    %40 = vector.load %arg10[%c0_31, %c0_32] : memref<64x128xbf16, #tpu.memory_space<vmem>>, vector<64x128xbf16>
    %41 = arith.truncf %21 : vector<128x256xf32> to vector<128x256xbf16>
    %cst_33 = arith.constant dense<0.000000e+00> : vector<64x256xf32>
    %42 = tpu.matmul %40, %41, %cst_33 {dimension_numbers = #tpu.dot_dimension_numbers<[1], [0], [0], [1], [0, 0, 1, 1], [], []>} : vector<64x128xbf16>, vector<128x256xbf16>, vector<64x256xf32> -> vector<64x256xf32>
    %43 = arith.addf %39, %42 : vector<64x256xf32>
    %c0_34 = arith.constant 0 : index
    %c0_35 = arith.constant 0 : index
    %44 = vector.load %arg11[%c0_34, %c0_35] : memref<64x128xbf16, #tpu.memory_space<vmem>>, vector<64x128xbf16>
    %45 = arith.truncf %26 : vector<128x256xf32> to vector<128x256xbf16>
    %cst_36 = arith.constant dense<0.000000e+00> : vector<64x256xf32>
    %46 = tpu.matmul %44, %45, %cst_36 {dimension_numbers = #tpu.dot_dimension_numbers<[1], [0], [0], [1], [0, 0, 1, 1], [], []>} : vector<64x128xbf16>, vector<128x256xbf16>, vector<64x256xf32> -> vector<64x256xf32>
    %47 = arith.addf %43, %46 : vector<64x256xf32>
    %c0_37 = arith.constant 0 : index
    %c0_38 = arith.constant 0 : index
    %48 = vector.load %arg12[%c0_37, %c0_38] : memref<64x128xbf16, #tpu.memory_space<vmem>>, vector<64x128xbf16>
    %49 = arith.truncf %28 : vector<128x1xf32> to vector<128x1xbf16>
    %cst_39 = arith.constant dense<0.000000e+00> : vector<64x1xf32>
    %50 = tpu.matmul %48, %49, %cst_39 {dimension_numbers = #tpu.dot_dimension_numbers<[1], [0], [0], [1], [0, 0, 1, 1], [], []>} : vector<64x128xbf16>, vector<128x1xbf16>, vector<64x1xf32> -> vector<64x1xf32>
    %51 = vector.broadcast %50 : vector<64x1xf32> to vector<64x256xf32>
    %52 = arith.addf %47, %51 : vector<64x256xf32>
    %cst_40 = arith.constant 0.000000e+00 : f32
    %53 = vector.broadcast %cst_40 : f32 to vector<64x256xf32>
    %54 = arith.maximumf %52, %53 : vector<64x256xf32>
    %c0_41 = arith.constant 0 : index
    %c0_42 = arith.constant 0 : index
    %55 = vector.load %arg13[%c0_41, %c0_42] : memref<64x64xbf16, #tpu.memory_space<vmem>>, vector<64x64xbf16>
    %56 = arith.truncf %54 : vector<64x256xf32> to vector<64x256xbf16>
    %cst_43 = arith.constant dense<0.000000e+00> : vector<64x256xf32>
    %57 = tpu.matmul %55, %56, %cst_43 {dimension_numbers = #tpu.dot_dimension_numbers<[1], [0], [0], [1], [0, 0, 1, 1], [], []>} : vector<64x64xbf16>, vector<64x256xbf16>, vector<64x256xf32> -> vector<64x256xf32>
    %cst_44 = arith.constant 0.000000e+00 : f32
    %58 = vector.broadcast %cst_44 : f32 to vector<64x256xf32>
    %59 = arith.maximumf %57, %58 : vector<64x256xf32>
    %c0_45 = arith.constant 0 : index
    %c0_46 = arith.constant 0 : index
    %60 = vector.load %arg14[%c0_45, %c0_46] : memref<32x64xbf16, #tpu.memory_space<vmem>>, vector<32x64xbf16>
    %61 = arith.truncf %59 : vector<64x256xf32> to vector<64x256xbf16>
    %cst_47 = arith.constant dense<0.000000e+00> : vector<32x256xf32>
    %62 = tpu.matmul %60, %61, %cst_47 {dimension_numbers = #tpu.dot_dimension_numbers<[1], [0], [0], [1], [0, 0, 1, 1], [], []>} : vector<32x64xbf16>, vector<64x256xbf16>, vector<32x256xf32> -> vector<32x256xf32>
    %cst_48 = arith.constant 0.000000e+00 : f32
    %63 = vector.broadcast %cst_48 : f32 to vector<32x256xf32>
    %64 = arith.maximumf %62, %63 : vector<32x256xf32>
    %c0_49 = arith.constant 0 : index
    %c0_50 = arith.constant 0 : index
    %c0_51 = arith.constant 0 : index
    %65 = vector.load %arg15[%c0_49, %c0_50, %c0_51] : memref<1x32x256xf32, #tpu.memory_space<vmem>>, vector<1x32x256xf32>
    %66 = vector.shape_cast %65 : vector<1x32x256xf32> to vector<32x256xf32>
    %67 = vector.shape_cast %64 : vector<32x256xf32> to vector<1x32x256xf32>
    tpu.vector_store %arg15[%c0_49, %c0_50, %c0_51], %67 {strides = array<i32>} : memref<1x32x256xf32, #tpu.memory_space<vmem>>, vector<1x32x256xf32>,
    return
  }
  func.func @transform_0(%arg0: i32) -> (i32, i32, i32) {
    %c0_i32 = arith.constant 0 : i32
    %c0_i32_0 = arith.constant 0 : i32
    %c0_i32_1 = arith.constant 0 : i32
    return %arg0, %c0_i32, %c0_i32_0 : i32, i32, i32
  }
  func.func @transform_1(%arg0: i32) -> (i32, i32) {
    %c0_i32 = arith.constant 0 : i32
    %c0_i32_0 = arith.constant 0 : i32
    %c0_i32_1 = arith.constant 0 : i32
    return %c0_i32, %c0_i32_0 : i32, i32
  }
  func.func @transform_2(%arg0: i32) -> (i32, i32) {
    %c0_i32 = arith.constant 0 : i32
    %c0_i32_0 = arith.constant 0 : i32
    %c0_i32_1 = arith.constant 0 : i32
    return %c0_i32, %c0_i32_0 : i32, i32
  }
  func.func @transform_3(%arg0: i32) -> (i32, i32) {
    %c0_i32 = arith.constant 0 : i32
    %c0_i32_0 = arith.constant 0 : i32
    %c0_i32_1 = arith.constant 0 : i32
    return %c0_i32, %c0_i32_0 : i32, i32
  }
  func.func @transform_4(%arg0: i32) -> (i32, i32) {
    %c0_i32 = arith.constant 0 : i32
    %c0_i32_0 = arith.constant 0 : i32
    %c0_i32_1 = arith.constant 0 : i32
    return %c0_i32, %c0_i32_0 : i32, i32
  }
  func.func @transform_5(%arg0: i32) -> (i32, i32) {
    %c0_i32 = arith.constant 0 : i32
    %c0_i32_0 = arith.constant 0 : i32
    %c0_i32_1 = arith.constant 0 : i32
    return %c0_i32, %c0_i32_0 : i32, i32
  }
  func.func @transform_6(%arg0: i32) -> (i32, i32) {
    %c0_i32 = arith.constant 0 : i32
    %c0_i32_0 = arith.constant 0 : i32
    %c0_i32_1 = arith.constant 0 : i32
    return %c0_i32, %c0_i32_0 : i32, i32
  }
  func.func @transform_7(%arg0: i32) -> (i32, i32) {
    %c0_i32 = arith.constant 0 : i32
    %c0_i32_0 = arith.constant 0 : i32
    %c0_i32_1 = arith.constant 0 : i32
    return %c0_i32, %c0_i32_0 : i32, i32
  }
  func.func @transform_8(%arg0: i32) -> (i32, i32) {
    %c0_i32 = arith.constant 0 : i32
    %c0_i32_0 = arith.constant 0 : i32
    %c0_i32_1 = arith.constant 0 : i32
    return %c0_i32, %c0_i32_0 : i32, i32
  }
  func.func @transform_9(%arg0: i32) -> (i32, i32) {
    %c0_i32 = arith.constant 0 : i32
    %c0_i32_0 = arith.constant 0 : i32
    %c0_i32_1 = arith.constant 0 : i32
    return %c0_i32, %c0_i32_0 : i32, i32
  }
  func.func @transform_10(%arg0: i32) -> (i32, i32) {
    %c0_i32 = arith.constant 0 : i32
    %c0_i32_0 = arith.constant 0 : i32
    %c0_i32_1 = arith.constant 0 : i32
    return %c0_i32, %c0_i32_0 : i32, i32
  }
  func.func @transform_11(%arg0: i32) -> (i32, i32) {
    %c0_i32 = arith.constant 0 : i32
    %c0_i32_0 = arith.constant 0 : i32
    %c0_i32_1 = arith.constant 0 : i32
    return %c0_i32, %c0_i32_0 : i32, i32
  }
  func.func @transform_12(%arg0: i32) -> (i32, i32) {
    %c0_i32 = arith.constant 0 : i32
    %c0_i32_0 = arith.constant 0 : i32
    %c0_i32_1 = arith.constant 0 : i32
    return %c0_i32, %c0_i32_0 : i32, i32
  }
  func.func @transform_13(%arg0: i32) -> (i32, i32) {
    %c0_i32 = arith.constant 0 : i32
    %c0_i32_0 = arith.constant 0 : i32
    %c0_i32_1 = arith.constant 0 : i32
    return %c0_i32, %c0_i32_0 : i32, i32
  }
  func.func @transform_14(%arg0: i32) -> (i32, i32, i32) {
    %c0_i32 = arith.constant 0 : i32
    %c0_i32_0 = arith.constant 0 : i32
    %c0_i32_1 = arith.constant 0 : i32
    return %arg0, %c0_i32, %c0_i32_0 : i32, i32, i32
  }
}

</mosaic_0001>

<bundles_post_ra>
// kernel: tpu_custom_call.1
= control target key start
LH: loop header
LB: loop body
LE: loop exit
PB: predicated region body
PF: predicated region fallthrough
CT: control target
= control target key end

     0   :  { %s3218_s0 = inlined_call_operand.vmem [shape: f32[2,3,256], index: 0, kind: input, shape index: {}]   ;;  %s3219_s1 = inlined_call_operand.vmem [shape: bf16[16,3], index: 1, kind: input, shape index: {}]   ;;  %s3220_s2 = inlined_call_operand.vmem [shape: bf16[32,16], index: 2, kind: input, shape index: {}]   ;;  %s3221_s3 = inlined_call_operand.vmem [shape: bf16[32,32], index: 3, kind: input, shape index: {}]   ;;  %s3222_s4 = inlined_call_operand.vmem [shape: bf16[128,32], index: 4, kind: input, shape index: {}]   ;;  %s3223_s5 = inlined_call_operand.vmem [shape: bf16[128,128], index: 5, kind: input, shape index: {}]   ;;  %s3224_s6 = inlined_call_operand.vmem [shape: bf16[64,16], index: 6, kind: input, shape index: {}]   ;;  %s3225_s7 = inlined_call_operand.vmem [shape: bf16[64,32], index: 7, kind: input, shape index: {}]   ;;  %s3226_s8 = inlined_call_operand.vmem [shape: bf16[64,32], index: 8, kind: input, shape index: {}]   ;;  %s3227_s9 = inlined_call_operand.vmem [shape: bf16[64,128], index: 9, kind: input, shape index: {}]   ;;  %s3228_s10 = inlined_call_operand.vmem [shape: bf16[64,128], index: 10, kind: input, shape index: {}]   ;;  %s3229_s11 = inlined_call_operand.vmem [shape: bf16[64,128], index: 11, kind: input, shape index: {}]   ;;  %s3230_s12 = inlined_call_operand.vmem [shape: bf16[64,64], index: 12, kind: input, shape index: {}]   ;;  %s3231_s13 = inlined_call_operand.vmem [shape: bf16[32,64], index: 13, kind: input, shape index: {}]   ;;  %s3232_s14 = inlined_call_operand.hbm [shape: f32[2,32,256], index: 14, kind: output, shape index: {}]  }
   0x1   :  { %3233 = sst [smem:[#allocation5_spill]] %s3218_s0 }
   0x2   :  { %3234 = sst [smem:[#allocation6_spill]] %s3219_s1 }
   0x3   :  { %3235 = sst [smem:[#allocation7_spill]] %s3220_s2 }
   0x4   :  { %3236 = sst [smem:[#allocation8_spill]] %s3221_s3 }
   0x5   :  { %19 = vsyncpa [#allocation3], 0 }
   0x6   :  { %21 = vsyncpa [#allocation3 + $0x1], 0  ;;  %s2685_s29 = smov 0   ;;  %s2687_s30 = smov 0  }
   0x7   :  { %s2689_s15 = smov 0   ;;  %s2691_s16 = smov 0  }
   0x8 LB: > { %s2706_s17 = sadd.s32 4294967295, %s2603_s16   ;;  %s2314_s18 = sadd.s32 4294967294, %s2603_s16   ;;  %s2603_s16 = sphi %s2691_s16, %s3246_s16   ;;  %s2599_s15 = sphi %s2689_s15, %s3245_s15   ;;  %s2595_s30 = sphi %s2687_s30, %s3244_s30   ;;  %s2591_s29 = sphi %s2685_s29, %s3243_s29  }
   0x9   : > { %s2710_s19 = sadd.s32 1, %s2603_s16   ;;  %s333_s20 = sadd.s32 1, %s2599_s15 }
   0xa   : > { %s330_s21 = ssub.s32 %s2603_s16, %s2710_s19  ;;  %p343_p0 = scmp.ne.s32.totalorder %s2599_s15, %s2595_s30 }
   0xb   : > { %p331_p1 = scmp.eq.s32.totalorder %s330_s21, 0  ;;  %p344_p2 = scmp.eq.s32.totalorder %s2706_s17, 1 }
   0xc   : > { %p349_p3 = scmp.ne.s32.totalorder %s2595_s30, %s2591_s29  ;;  %p350_p4 = scmp.eq.s32.totalorder %s2314_s18, 1 }
   0xd   : > { %s2721_s22 = scalar_select %p331_p1, %s2599_s15, %s333_s20  }
   0xe   : > { %p2723_p5 = por %p344_p2, %p343_p0  ;;  %p2727_p6 = por %p350_p4, %p349_p3 }
   0xf   : > { %p2317_p7 = scmp.ge.s32.totalorder %s2603_s16, 1  ;;  %p415_p8 = scmp.lt.s32.totalorder %s2603_s16, 3 }
  0x11   : > { %p416_p9 = pnand %p2317_p7, %p415_p8 }
  0x12   : > { %p461_p10 = scmp.lt.s32.totalorder (!%p416_p9), %s2706_s17, 1  ;;  %s3239_s0 = sld [smem:[#allocation5_spill]] (!%p416_p9) }
  0x13   : > { %419 = sbr.rel (%p416_p9) target bundleno = 2226 (0x8b2), region = 76  ;;  %s3240_s1 = sld [smem:[#allocation6_spill]] (!%p416_p9) }
  0x14   : > { %s3241_s2 = sld [smem:[#allocation7_spill]] (!%p416_p9)  ;;  %s2409_s20 = sshll.u32 (!%p416_p9), %s2706_s17, 10 }
  0x15   : > { %s3242_s3 = sld [smem:[#allocation8_spill]] (!%p416_p9)  ;;  %s3172_s27 = scalar_lea.hbm (!%p416_p9), %s3232_s14, %s2409_s20 }
  0x18   : > { %vm484_vm0 = vcmask 1040384   ;;  %vm485_vm1 = vcmask 1041408   ;;  %v2605_v0 = vmov 65535   ;;  %v2606_v2 = vmov 0   ;;  %s462_s25 = scalar_select %p461_p10, %s2706_s17, 1 }
  0x19   : > { %v486_v1 = vsel %vm484_vm0, 4294967295, %v2605_v0  ;;  %526 = vmatprep.mubr.bf16.mxu0 %v2606_v2  ;;  %596 = vmatprep.mubr.bf16.mxu1 %v2606_v2  ;;  %vm480_vm2 = vcmask 23552   ;;  %v2492_v10 = vld [vmem:[%s3240_s1] sm:$0xff]   ;;  %vm557_vm3 = vcmask 130048   ;;  %vm643_vm4 = vcmask 261120   ;;  %s2607_s1 = smov [#allocation2]  }
  0x1a   : > { %2490 = vset.pattern.permute.xlu1 %v2606_v2  ;;  %2489 = vset.pattern.permute.xlu0 %v2606_v2  ;;  %s2408_s26 = sshll.u32 %s462_s25, 3  ;;  %v487_v3 = vsel %vm485_vm1, %v486_v1, 0  ;;  %v2493_v21 = vld [vmem:[%s3241_s2] sm:$0xff]   ;;  %v2494_v22 = vld [vmem:[%s3241_s2 + $0x8] sm:$0xff]   ;;  %vm2039_vm5 = vcmask 523264   ;;  %s2547_s25 = sshll.u32 %s2607_s1, 4  ;;  %s2548_s25 = int_to_ptr.vmem [resolvable:$false] %s2547_s25 }
  0x1b   : > { %s465_s18 = scalar_lea.vmem %s3239_s0, %s2408_s26  ;;  %v2495_v43 = vld [vmem:[%s3242_s3] sm:$0xff]   ;;  %v2496_v44 = vld [vmem:[%s3242_s3 + $0x8] sm:$0xff]   ;;  %s458_s0 = sand.u32 1, %s2595_s30  }
  0x1c   : > { %v467_v4 = vld [vmem:[%s465_s18] sm:$0x77]  ;;  %s2318_s28 = sshll.u32 %s458_s0, 6  ;;  %s3178_s17 = scalar_lea.sflag [#allocation3], %s458_s0 }
  0x1d   : > { %v471_v5 = vcombine.high %v467_v4, %v467_v4  ;;  %v473_v6 = vpack.c.bf16 %v467_v4, %v467_v4  ;;  %v2497_v1 = vld [vmem:[%s3222_s4] sm:$0xff]   ;;  %v2499_v4 = vld [vmem:[%s3222_s4 + $0x10] sm:$0xff]   ;;  %s460_s18 = scalar_lea.vmem [#allocation2], %s2318_s28  ;;  %s2549_s20 = scalar_lea.vmem %s2548_s25, 2048 }
  0x1e   : > { %s2252_s21 = sshll.u32 %s460_s18, 4  ;;  %s3174_s21 = int_to_ptr.vmem [resolvable:$true] %s2252_s21 }
  0x1f   : > { %v474_v7 = vpack.c.bf16 %v471_v5, %v471_v5  ;;  %v489_v8 = vand.u32 %v487_v3, %v473_v6  ;;  %v2500_v5 = vld [vmem:[%s3222_s4 + $0x18] sm:$0xff]   ;;  %v2501_v6 = vld [vmem:[%s3222_s4 + $0x20] sm:$0xff]   ;;  %s2543_s28 = scalar_lea.vmem %s3174_s21, 1024  ;;  %p2550_p0 = scmp.lt.s32.totalorder %s3174_s21, %s2548_s25 }
  0x20   : > { %p2544_p11 = scmp.ne.s32.totalorder %s3174_s21, %s2543_s28  ;;  %p2551_p1 = scmp.lt.s32.totalorder %s2549_s20, %s2543_s28 }
  0x21   : > { %v492_v9 = vand.u32 %v487_v3, %v474_v7  ;;  %v2498_v3 = vld [vmem:[%s3222_s4 + $0x8] sm:$0xff]  }
  0x22   : > { %v2502_v7 = vld [vmem:[%s3222_s4 + $0x28] sm:$0xff]   ;;  %p2545_p12 = pnand %p2544_p11, %p2723_p5  ;;  %p2552_p2 = por %p2551_p1, %p2550_p0 }
  0x23   : > { %508 = vmatprep.subr.bf16.mxu0 %v492_v9  ;;  %v2504_v9 = vld [vmem:[%s3222_s4 + $0x38] sm:$0xff]  }
  0x24   : > { %509 = vmatpush1.bf16.msra.mxu0 %v489_v8  ;;  %v2503_v8 = vld [vmem:[%s3222_s4 + $0x30] sm:$0xff]   ;;  %p2546_p13 = pneg %p2545_p12 }
  0x26   : > { %p2553_p3 = pnand %p2552_p2, %p2546_p13 }
  0x27   : > { %2322 = vmatmul.mubr.msk.bf16.vlgmr.msra.gmra.mxu0 %vm480_vm2, %v2492_v10  ;;  %v2505_v10 = vld [vmem:[%s3225_s7] sm:$0xff]  }
  0x28   : > { %682 = vmatprep.mubr.bf16.mxu0 %v2606_v2 }
  0xe7   : > { %v528_v11 = vpop.f32.mrf.mxu0 }
  0xe8   : > { %v537_v18 = vmax.f32 %v528_v11, 0.0 }
  0xe9   : > { %v530_v12 = vpop.f32.mrf.mxu0 }
  0xea   : > { %v538_v16 = vmax.f32 %v530_v12, 0.0 }
  0xeb   : > { %v532_v13 = vpop.f32.mrf.mxu0 }
  0xec   : > { %v539_v14 = vmax.f32 %v532_v13, 0.0 }
  0xed   : > { %v534_v15 = vpop.f32.mrf.mxu0 }
  0xee   : > { %v540_v17 = vmax.f32 %v534_v15, 0.0  ;;  %v2748_v20 = vpack.c.bf16 %v539_v14, %v537_v18 }
  0xf0   : > { %v2746_v19 = vpack.c.bf16 %v540_v17, %v538_v16 }
  0xf2   : > { %578 = vmatprep.subr.bf16.mxu1 %v2746_v19 }
  0xf3   : > { %579 = vmatpush1.bf16.msra.mxu1 %v2748_v20 }
  0xf6   : > { %2325 = vmatmul.mubr.msk.bf16.vlgmr.msra.gmra.mxu1 %vm557_vm3, %v2493_v21 }
  0xf7   : > { %606 = vmatprep.mubr.bf16.mxu1 %v2606_v2 }
  0xfe   : > { %2326 = vmatmul.mubr.msk.bf16.gmra.mxu1 %vm557_vm3, %v2494_v22 }
  0xff   : > { %827 = vmatprep.mubr.bf16.mxu1 %v2606_v2 }
 0x1b6   : > { %v598_v23 = vpop.f32.mrf.mxu1 }
 0x1b7   : > { %v617_v41 = vmax.f32 %v598_v23, 0.0 }
 0x1b8   : > { %v600_v24 = vpop.f32.mrf.mxu1 }
 0x1b9   : > { %v618_v36 = vmax.f32 %v600_v24, 0.0 }
 0x1ba   : > { %v602_v25 = vpop.f32.mrf.mxu1 }
 0x1bb   : > { %v619_v38 = vmax.f32 %v602_v25, 0.0 }
 0x1bc   : > { %v604_v26 = vpop.f32.mrf.mxu1 }
 0x1bd   : > { %v620_v32 = vmax.f32 %v604_v26, 0.0  ;;  %v629_v42 = vpack.c.bf16 %v619_v38, %v617_v41 }
 0x1be   : > { %v608_v27 = vpop.f32.mrf.mxu1 }
 0x1bf   : > { %v621_v35 = vmax.f32 %v608_v27, 0.0  ;;  %v630_v40 = vpack.c.bf16 %v620_v32, %v618_v36 }
 0x1c0   : > { %v610_v28 = vpop.f32.mrf.mxu1 }
 0x1c1   : > { %v622_v33 = vmax.f32 %v610_v28, 0.0 }
 0x1c2   : > { %v612_v29 = vpop.f32.mrf.mxu1 }
 0x1c3   : > { %v623_v30 = vmax.f32 %v612_v29, 0.0 }
 0x1c4   : > { %v614_v31 = vpop.f32.mrf.mxu1 }
 0x1c5   : > { %v624_v34 = vmax.f32 %v614_v31, 0.0  ;;  %v631_v39 = vpack.c.bf16 %v623_v30, %v621_v35 }
 0x1c7   : > { %v632_v37 = vpack.c.bf16 %v624_v34, %v622_v33 }
 0x1c9   : > { %662 = vmatprep.subr.bf16.mxu0 %v632_v37 }
 0x1ca   : > { %663 = vmatpush1.bf16.msra.mxu0 %v631_v39 }
 0x1cb   : > { %664 = vmatprep.subr.bf16.mxu0 %v630_v40 }
 0x1ce   : > { %665 = vmatpush1.bf16.msra.mxu0 %v629_v42 }
 0x1d1   : > { %2329 = vmatmul.mubr.msk.bf16.vlgmr.msra.gmra.mxu0 %vm643_vm4, %v2495_v43 }
 0x1d2   : > { %692 = vmatprep.mubr.bf16.mxu0 %v2606_v2 }
 0x1d9   : > { %2330 = vmatmul.mubr.msk.bf16.gmra.mxu0 %vm643_vm4, %v2496_v44 }
 0x1da   : > { %1052 = vmatprep.mubr.bf16.mxu0 %v2606_v2 }
 0x291   : > { %v684_v45 = vpop.f32.mrf.mxu0 }
 0x292   : > { %v703_v63 = vmax.f32 %v684_v45, 0.0 }
 0x293   : > { %v686_v46 = vpop.f32.mrf.mxu0 }
 0x294   : > { %v704_v58 = vmax.f32 %v686_v46, 0.0 }
 0x295   : > { %v688_v47 = vpop.f32.mrf.mxu0 }
 0x296   : > { %v705_v60 = vmax.f32 %v688_v47, 0.0 }
 0x297   : > { %v690_v48 = vpop.f32.mrf.mxu0 }
 0x298   : > { %v706_v54 = vmax.f32 %v690_v48, 0.0  ;;  %v727_v0 = vpack.c.bf16 %v705_v60, %v703_v63 }
 0x299   : > { %v694_v49 = vpop.f32.mrf.mxu0 }
 0x29a   : > { %v707_v57 = vmax.f32 %v694_v49, 0.0  ;;  %v728_v62 = vpack.c.bf16 %v706_v54, %v704_v58 }
 0x29b   : > { %v696_v50 = vpop.f32.mrf.mxu0 }
 0x29c   : > { %v708_v55 = vmax.f32 %v696_v50, 0.0 }
 0x29d   : > { %v698_v51 = vpop.f32.mrf.mxu0 }
 0x29e   : > { %v709_v52 = vmax.f32 %v698_v51, 0.0 }
 0x29f   : > { %v700_v53 = vpop.f32.mrf.mxu0 }
 0x2a0   : > { %v710_v56 = vmax.f32 %v700_v53, 0.0  ;;  %v729_v61 = vpack.c.bf16 %v709_v52, %v707_v57 }
 0x2a2   : > { %v730_v59 = vpack.c.bf16 %v710_v56, %v708_v55 }
 0x2a4   : > { %807 = vmatprep.subr.bf16.mxu1 %v730_v59 }
 0x2a5   : > { %808 = vmatpush1.bf16.msra.mxu1 %v729_v61 }
 0x2a6   : > { %809 = vmatprep.subr.bf16.mxu1 %v728_v62 }
 0x2a9   : > { %810 = vmatpush1.bf16.msra.mxu1 %v727_v0 }
 0x2aa   : > { %1273 = vmatprep.subr.bf16.mxu1 %v632_v37 }
 0x2ac   : > { %2339 = vmatmul.mubr.msk.bf16.vlgmr.msra.gmra.mxu1 %vm643_vm4, %v2497_v1 }
 0x2ad   : > { %1274 = vmatpush1.bf16.msra.mxu1 %v631_v39  ;;  %837 = vmatprep.mubr.bf16.mxu1 %v2606_v2 }
 0x2ae   : > { %1275 = vmatprep.subr.bf16.mxu1 %v630_v40 }
 0x2b1   : > { %1276 = vmatpush1.bf16.msra.mxu1 %v629_v42 }
 0x2b2   : > { %1491 = vmatprep.subr.bf16.mxu1 %v730_v59 }
 0x2b4   : > { %2340 = vmatmul.mubr.msk.bf16.gmra.mxu1 %vm643_vm4, %v2498_v3 }
 0x2b5   : > { %847 = vmatprep.mubr.bf16.mxu1 %v2606_v2 }
 0x2bc   : > { %2341 = vmatmul.mubr.msk.bf16.gmra.mxu1 %vm643_vm4, %v2499_v4 }
 0x2bd   : > { %857 = vmatprep.mubr.bf16.mxu1 %v2606_v2 }
 0x2c4   : > { %2342 = vmatmul.mubr.msk.bf16.gmra.mxu1 %vm643_vm4, %v2500_v5 }
 0x2c5   : > { %867 = vmatprep.mubr.bf16.mxu1 %v2606_v2 }
 0x2cc   : > { %2343 = vmatmul.mubr.msk.bf16.gmra.mxu1 %vm643_vm4, %v2501_v6 }
 0x2cd   : > { %877 = vmatprep.mubr.bf16.mxu1 %v2606_v2 }
 0x2d4   : > { %2344 = vmatmul.mubr.msk.bf16.gmra.mxu1 %vm643_vm4, %v2502_v7 }
 0x2d5   : > { %887 = vmatprep.mubr.bf16.mxu1 %v2606_v2 }
 0x2dc   : > { %2345 = vmatmul.mubr.msk.bf16.gmra.mxu1 %vm643_vm4, %v2503_v8 }
 0x2dd   : > { %897 = vmatprep.mubr.bf16.mxu1 %v2606_v2 }
 0x2e4   : > { %2346 = vmatmul.mubr.msk.bf16.gmra.mxu1 %vm643_vm4, %v2504_v9 }
 0x2e5   : > { %1293 = vmatprep.mubr.bf16.mxu1 %v2606_v2 }
 0x2ec   : > { %2359 = vmatmul.mubr.msk.bf16.vlgmr.msra.gmra.mxu1 %vm643_vm4, %v2505_v10 }
 0x2ed   : > { %1492 = vmatpush1.bf16.msra.mxu1 %v729_v61  ;;  %1303 = vmatprep.mubr.bf16.mxu1 %v2606_v2 }
 0x2ee   : > { %1493 = vmatprep.subr.bf16.mxu1 %v728_v62 }
 0x2f1   : > { %1494 = vmatpush1.bf16.msra.mxu1 %v727_v0 }
 0x36c   : > { %v829_v11 = vpop.f32.mrf.mxu1 }
 0x36d   : > { %v908_v14 = vmax.f32 %v829_v11, 0.0 }
 0x36e   : > { %v831_v12 = vpop.f32.mrf.mxu1 }
 0x36f   : > { %v909_v17 = vmax.f32 %v831_v12, 0.0 }
 0x370   : > { %v833_v13 = vpop.f32.mrf.mxu1 }
 0x371   : > { %v910_v15 = vmax.f32 %v833_v13, 0.0 }
 0x372   : > { %v835_v16 = vpop.f32.mrf.mxu1 }
 0x373   : > { %v2817_v18 = vpack.c.bf16 %v910_v15, %v908_v14  ;;  %v911_v21 = vmax.f32 %v835_v16, 0.0 }
 0x374   : > { %v839_v22 = vpop.f32.mrf.mxu1 }
 0x375   : > { %v2819_v23 = vpack.c.bf16 %v911_v21, %v909_v17  ;;  %v912_v26 = vmax.f32 %v839_v22, 0.0 }
 0x376   : > { %v841_v24 = vpop.f32.mrf.mxu1 }
 0x377   : > { %v913_v29 = vmax.f32 %v841_v24, 0.0 }
 0x378   : > { %v843_v25 = vpop.f32.mrf.mxu1 }
 0x379   : > { %v914_v27 = vmax.f32 %v843_v25, 0.0 }
 0x37a   : > { %v845_v28 = vpop.f32.mrf.mxu1 }
 0x37b   : > { %v2821_v30 = vpack.c.bf16 %v914_v27, %v912_v26  ;;  %v915_v31 = vmax.f32 %v845_v28, 0.0 }
 0x37c   : > { %v2823_v32 = vpop.f32.mrf.mxu1 }
 0x37d   : > { %v2825_v33 = vpack.c.bf16 %v915_v31, %v913_v29 }
 0x37e   : > { %v2827_v34 = vpop.f32.mrf.mxu1 }
 0x37f   : > { %v917_v28 = vmax.f32 %v2827_v34, 0.0  ;;  %v2506_v34 = vld [vmem:[%s3223_s5] sm:$0xff]  }
 0x380   : > { %v2829_v35 = vpop.f32.mrf.mxu1 }
 0x381   : > { %v918_v29 = vmax.f32 %v2829_v35, 0.0  ;;  %v2508_v35 = vld [vmem:[%s3223_s5 + $0x10] sm:$0xff]  }
 0x382   : > { %v2831_v36 = vpop.f32.mrf.mxu1 }
 0x383   : > { %v919_v25 = vmax.f32 %v2831_v36, 0.0  ;;  %v2511_v36 = vld [vmem:[%s3223_s5 + $0x28] sm:$0xff]  }
 0x384   : > { %v859_v37 = vpop.f32.mrf.mxu1 }
 0x385   : > { %v920_v27 = vmax.f32 %v859_v37, 0.0  ;;  %v2512_v37 = vld [vmem:[%s3223_s5 + $0x30] sm:$0xff]  }
 0x386   : > { %v861_v38 = vpop.f32.mrf.mxu1 }
 0x387   : > { %v921_v21 = vmax.f32 %v861_v38, 0.0 }
 0x388   : > { %v863_v39 = vpop.f32.mrf.mxu1 }
 0x389   : > { %v922_v22 = vmax.f32 %v863_v39, 0.0  ;;  %v2513_v39 = vld [vmem:[%s3223_s5 + $0x38] sm:$0xff]  }
 0x38a   : > { %v865_v40 = vpop.f32.mrf.mxu1 }
 0x38b   : > { %v923_v15 = vmax.f32 %v865_v40, 0.0  ;;  %v962_v31 = vpack.c.bf16 %v922_v22, %v920_v27  ;;  %v916_v40 = vmax.f32 %v2823_v32, 0.0  ;;  %v2507_v32 = vld [vmem:[%s3223_s5 + $0x8] sm:$0xff]  }
 0x38c   : > { %v869_v41 = vpop.f32.mrf.mxu1 }
 0x38d   : > { %v924_v17 = vmax.f32 %v869_v41, 0.0  ;;  %v963_v26 = vpack.c.bf16 %v923_v15, %v921_v21  ;;  %v960_v38 = vpack.c.bf16 %v918_v29, %v916_v40  ;;  %v2514_v41 = vld [vmem:[%s3224_s6] sm:$0xff]  }
 0x38e   : > { %v871_v42 = vpop.f32.mrf.mxu1 }
 0x38f   : > { %v925_v12 = vmax.f32 %v871_v42, 0.0  ;;  %v961_v42 = vpack.c.bf16 %v919_v25, %v917_v28 }
 0x390   : > { %v873_v43 = vpop.f32.mrf.mxu1 }
 0x391   : > { %v926_v13 = vmax.f32 %v873_v43, 0.0  ;;  %v2515_v43 = vld [vmem:[%s3225_s7 + $0x8] sm:$0xff]  }
 0x392   : > { %v875_v44 = vpop.f32.mrf.mxu1  ;;  %2360 = vmatmul.mubr.msk.bf16.gmra.mxu1 %vm643_vm4, %v2515_v43 }
 0x393   : > { %v927_v9 = vmax.f32 %v875_v44, 0.0  ;;  %v964_v24 = vpack.c.bf16 %v926_v13, %v924_v17  ;;  %1313 = vmatprep.mubr.bf16.mxu1 %v2606_v2  ;;  %v2516_v44 = vld [vmem:[%s3225_s7 + $0x10] sm:$0xff]  }
 0x394   : > { %v879_v45 = vpop.f32.mrf.mxu1 }
 0x395   : > { %v928_v11 = vmax.f32 %v879_v45, 0.0  ;;  %v965_v16 = vpack.c.bf16 %v927_v9, %v925_v12  ;;  %v2521_v45 = vld [vmem:[%s3224_s6 + $0x10] sm:$0xff]  }
 0x396   : > { %v881_v46 = vpop.f32.mrf.mxu1 }
 0x397   : > { %v929_v6 = vmax.f32 %v881_v46, 0.0  ;;  %v2522_v46 = vld [vmem:[%s3226_s8 + $0x10] sm:$0xff]  }
 0x398   : > { %v883_v47 = vpop.f32.mrf.mxu1 }
 0x399   : > { %v930_v7 = vmax.f32 %v883_v47, 0.0  ;;  %v2523_v47 = vld [vmem:[%s3224_s6 + $0x18] sm:$0xff]  }
 0x39a   : > { %v885_v48 = vpop.f32.mrf.mxu1  ;;  %2361 = vmatmul.mubr.msk.bf16.gmra.mxu1 %vm643_vm4, %v2516_v44 }
 0x39b   : > { %v931_v3 = vmax.f32 %v885_v48, 0.0  ;;  %v966_v14 = vpack.c.bf16 %v930_v7, %v928_v11  ;;  %1323 = vmatprep.mubr.bf16.mxu1 %v2606_v2  ;;  %v2524_v48 = vld [vmem:[%s3226_s8 + $0x18] sm:$0xff]  }
 0x39c   : > { %v889_v49 = vpop.f32.mrf.mxu1 }
 0x39d   : > { %v932_v5 = vmax.f32 %v889_v49, 0.0  ;;  %v2841_v10 = vpack.c.bf16 %v931_v3, %v929_v6  ;;  %v2525_v49 = vld [vmem:[%s3227_s9] sm:$0xff]  }
 0x39e   : > { %v891_v50 = vpop.f32.mrf.mxu1 }
 0x39f   : > { %v933_v62 = vmax.f32 %v891_v50, 0.0  ;;  %v2527_v50 = vld [vmem:[%s3227_s9 + $0x8] sm:$0xff]  }
 0x3a0   : > { %v893_v51 = vpop.f32.mrf.mxu1 }
 0x3a1   : > { %v934_v0 = vmax.f32 %v893_v51, 0.0 }
 0x3a2   : > { %v895_v52 = vpop.f32.mrf.mxu1 }
 0x3a3   : > { %v935_v58 = vmax.f32 %v895_v52, 0.0  ;;  %v2839_v8 = vpack.c.bf16 %v934_v0, %v932_v5 }
 0x3a4   : > { %v899_v53 = vpop.f32.mrf.mxu1 }
 0x3a5   : > { %v936_v61 = vmax.f32 %v899_v53, 0.0  ;;  %v2835_v4 = vpack.c.bf16 %v935_v58, %v933_v62 }
 0x3a6   : > { %v901_v54 = vpop.f32.mrf.mxu1 }
 0x3a7   : > { %v937_v59 = vmax.f32 %v901_v54, 0.0 }
 0x3a8   : > { %v903_v55 = vpop.f32.mrf.mxu1 }
 0x3a9   : > { %v938_v56 = vmax.f32 %v903_v55, 0.0 }
 0x3aa   : > { %v905_v57 = vpop.f32.mrf.mxu1 }
 0x3ab   : > { %v939_v60 = vmax.f32 %v905_v57, 0.0  ;;  %v2833_v1 = vpack.c.bf16 %v938_v56, %v936_v61 }
 0x3ad   : > { %v971_v63 = vpack.c.bf16 %v939_v60, %v937_v59  ;;  %v2529_v59 = vld [vmem:[%s3227_s9 + $0x10] sm:$0xff]  }
 0x3af   : > { %1020 = vmatprep.subr.bf16.mxu0 %v971_v63 }
 0x3b0   : > { %1021 = vmatpush1.bf16.msra.mxu0 %v2833_v1 }
 0x3b1   : > { %1022 = vmatprep.subr.bf16.mxu0 %v2835_v4 }
 0x3b4   : > { %1023 = vmatpush1.bf16.msra.mxu0 %v2839_v8 }
 0x3b5   : > { %1024 = vmatprep.subr.bf16.mxu0 %v2841_v10 }
 0x3b8   : > { %1025 = vmatpush1.bf16.msra.mxu0 %v966_v14 }
 0x3b9   : > { %1026 = vmatprep.subr.bf16.mxu0 %v965_v16 }
 0x3bc   : > { %1027 = vmatpush1.bf16.msra.mxu0 %v964_v24 }
 0x3bd   : > { %1028 = vmatprep.subr.bf16.mxu0 %v963_v26 }
 0x3c0   : > { %1029 = vmatpush1.bf16.msra.mxu0 %v962_v31 }
 0x3c1   : > { %1030 = vmatprep.subr.bf16.mxu0 %v961_v42 }
 0x3c4   : > { %1031 = vmatpush1.bf16.msra.mxu0 %v960_v38 }
 0x3c5   : > { %1032 = vmatprep.subr.bf16.mxu0 %v2825_v33 }
 0x3c8   : > { %1033 = vmatpush1.bf16.msra.mxu0 %v2821_v30 }
 0x3c9   : > { %1034 = vmatprep.subr.bf16.mxu0 %v2819_v23 }
 0x3cc   : > { %1035 = vmatpush1.bf16.msra.mxu0 %v2817_v18 }
 0x3cd   : > { %1380 = vmatprep.subr.bf16.mxu0 %v2746_v19  ;;  %v2509_v19 = vld [vmem:[%s3223_s5 + $0x18] sm:$0xff]  }
 0x3cf   : > { %1053 = vmatmul.mubr.bf16.vlgmr.msra.gmra.mxu0 %v2506_v34 }
 0x3d0   : > { %1381 = vmatpush1.bf16.msra.mxu0 %v2748_v20  ;;  %1062 = vmatprep.mubr.bf16.mxu0 %v2606_v2  ;;  %v2510_v20 = vld [vmem:[%s3223_s5 + $0x20] sm:$0xff]  }
 0x3d1   : > { %1600 = vmatprep.subr.bf16.mxu0 %v971_v63 }
 0x3d7   : > { %1063 = vmatmul.mubr.bf16.gmra.mxu0 %v2507_v32 }
 0x3d8   : > { %1072 = vmatprep.mubr.bf16.mxu0 %v2606_v2 }
 0x3df   : > { %1073 = vmatmul.mubr.bf16.gmra.mxu0 %v2508_v35 }
 0x3e0   : > { %1082 = vmatprep.mubr.bf16.mxu0 %v2606_v2 }
 0x3e7   : > { %1083 = vmatmul.mubr.bf16.gmra.mxu0 %v2509_v19 }
 0x3e8   : > { %1092 = vmatprep.mubr.bf16.mxu0 %v2606_v2 }
 0x3ef   : > { %1093 = vmatmul.mubr.bf16.gmra.mxu0 %v2510_v20 }
 0x3f0   : > { %1102 = vmatprep.mubr.bf16.mxu0 %v2606_v2 }
 0x3f7   : > { %1103 = vmatmul.mubr.bf16.gmra.mxu0 %v2511_v36 }
 0x3f8   : > { %1112 = vmatprep.mubr.bf16.mxu0 %v2606_v2 }
 0x3ff   : > { %1113 = vmatmul.mubr.bf16.gmra.mxu0 %v2512_v37 }
 0x400   : > { %1122 = vmatprep.mubr.bf16.mxu0 %v2606_v2 }
 0x407   : > { %1123 = vmatmul.mubr.bf16.gmra.mxu0 %v2513_v39 }
 0x408   : > { %1398 = vmatprep.mubr.bf16.mxu0 %v2606_v2 }
 0x40f   : > { %2367 = vmatmul.mubr.msk.bf16.vlgmr.msra.gmra.mxu0 %vm557_vm3, %v2514_v41 }
 0x410   : > { %1601 = vmatpush1.bf16.msra.mxu0 %v2833_v1  ;;  %1408 = vmatprep.mubr.bf16.mxu0 %v2606_v2 }
 0x411   : > { %1602 = vmatprep.subr.bf16.mxu0 %v2835_v4 }
 0x414   : > { %1603 = vmatpush1.bf16.msra.mxu0 %v2839_v8 }
 0x415   : > { %1604 = vmatprep.subr.bf16.mxu0 %v2841_v10 }
 0x418   : > { %1605 = vmatpush1.bf16.msra.mxu0 %v966_v14 }
 0x419   : > { %1606 = vmatprep.subr.bf16.mxu0 %v965_v16 }
 0x41c   : > { %1607 = vmatpush1.bf16.msra.mxu0 %v964_v24 }
 0x41d   : > { %1608 = vmatprep.subr.bf16.mxu0 %v963_v26 }
 0x420   : > { %1609 = vmatpush1.bf16.msra.mxu0 %v962_v31 }
 0x421   : > { %1610 = vmatprep.subr.bf16.mxu0 %v961_v42 }
 0x424   : > { %1611 = vmatpush1.bf16.msra.mxu0 %v960_v38 }
 0x425   : > { %1612 = vmatprep.subr.bf16.mxu0 %v2825_v33  ;;  %v2520_v33 = vld [vmem:[%s3226_s8 + $0x8] sm:$0xff]  }
 0x428   : > { %1613 = vmatpush1.bf16.msra.mxu0 %v2821_v30  ;;  %v2519_v30 = vld [vmem:[%s3224_s6 + $0x8] sm:$0xff]  }
 0x429   : > { %1614 = vmatprep.subr.bf16.mxu0 %v2819_v23  ;;  %v2518_v23 = vld [vmem:[%s3226_s8] sm:$0xff]   ;;  %2368 = vmatmul.mubr.msk.bf16.gmra.mxu0 %vm557_vm3, %v2519_v30 }
 0x42a   : > { %1418 = vmatprep.mubr.bf16.mxu0 %v2606_v2 }
 0x42c   : > { %1615 = vmatpush1.bf16.msra.mxu0 %v2817_v18  ;;  %v2517_v18 = vld [vmem:[%s3225_s7 + $0x18] sm:$0xff]  }
 0x42d   : > { %2362 = vmatmul.mubr.msk.bf16.gmra.mxu1 %vm643_vm4, %v2517_v18 }
 0x42e   : > { %1511 = vmatprep.mubr.bf16.mxu1 %v2606_v2 }
 0x431   : > { %2369 = vmatmul.mubr.msk.bf16.gmra.mxu0 %vm557_vm3, %v2521_v45 }
 0x432   : > { %1428 = vmatprep.mubr.bf16.mxu0 %v2606_v2 }
 0x435   : > { %2375 = vmatmul.mubr.msk.bf16.vlgmr.msra.gmra.mxu1 %vm643_vm4, %v2518_v23 }
 0x436   : > { %1521 = vmatprep.mubr.bf16.mxu1 %v2606_v2 }
 0x439   : > { %2370 = vmatmul.mubr.msk.bf16.gmra.mxu0 %vm557_vm3, %v2523_v47 }
 0x43a   : > { %1632 = vmatprep.mubr.bf16.mxu0 %v2606_v2 }
 0x43d   : > { %2376 = vmatmul.mubr.msk.bf16.gmra.mxu1 %vm643_vm4, %v2520_v33 }
 0x43e   : > { %1531 = vmatprep.mubr.bf16.mxu1 %v2606_v2 }
 0x441   : > { %1633 = vmatmul.mubr.bf16.vlgmr.msra.gmra.mxu0 %v2525_v49 }
 0x442   : > { %1642 = vmatprep.mubr.bf16.mxu0 %v2606_v2 }
 0x445   : > { %2377 = vmatmul.mubr.msk.bf16.gmra.mxu1 %vm643_vm4, %v2522_v46 }
 0x446   : > { %1541 = vmatprep.mubr.bf16.mxu1 %v2606_v2 }
 0x449   : > { %1643 = vmatmul.mubr.bf16.gmra.mxu0 %v2527_v50 }
 0x44a   : > { %1652 = vmatprep.mubr.bf16.mxu0 %v2606_v2 }
 0x44d   : > { %2378 = vmatmul.mubr.msk.bf16.gmra.mxu1 %vm643_vm4, %v2524_v48 }
 0x44e   : > { %1769 = vmatprep.mubr.bf16.mxu1 %v2606_v2 }
 0x451   : > { %1653 = vmatmul.mubr.bf16.gmra.mxu0 %v2529_v59 }
 0x452   : > { %1662 = vmatprep.mubr.bf16.mxu0 %v2606_v2 }
 0x48f   : > { %v1054_v51 = vpop.f32.mrf.mxu0 }
 0x490   : > { %v1133_v53 = vmax.f32 %v1054_v51, 0.0 }
 0x491   : > { %v1056_v52 = vpop.f32.mrf.mxu0 }
 0x492   : > { %v1134_v54 = vmax.f32 %v1056_v52, 0.0 }
 0x493   : > { %v1058_v55 = vpop.f32.mrf.mxu0 }
 0x494   : > { %v1135_v56 = vmax.f32 %v1058_v55, 0.0  ;;  %v2958_v57 = vmax.f32 %v1133_v53, %v1134_v54 }
 0x495   : > { %v1060_v58 = vpop.f32.mrf.mxu0 }
 0x496   : > { %v2963_v60 = vpack.c.bf16 %v1135_v56, %v1133_v53  ;;  %v1136_v61 = vmax.f32 %v1060_v58, 0.0  ;;  %v2531_v58 = vld [vmem:[%s3227_s9 + $0x18] sm:$0xff]  }
 0x497   : > { %v2965_v62 = vpop.f32.mrf.mxu0  ;;  %1663 = vmatmul.mubr.bf16.gmra.mxu0 %v2531_v58 }
 0x498   : > { %v2967_v63 = vpack.c.bf16 %v1136_v61, %v1134_v54  ;;  %v2969_v0 = vmax.f32 %v1135_v56, %v1136_v61  ;;  %v1137_v3 = vmax.f32 %v2965_v62, 0.0  ;;  %v2530_v62 = vld [vmem:[%s3228_s10 + $0x10] sm:$0xff]  }
 0x499   : > { %v2971_v1 = vpop.f32.mrf.mxu0 }
 0x49a   : > { %v1138_v4 = vmax.f32 %v2971_v1, 0.0  ;;  %v2528_v1 = vld [vmem:[%s3228_s10 + $0x8] sm:$0xff]  }
 0x49b   : > { %v2976_v5 = vpop.f32.mrf.mxu0 }
 0x49c   : > { %v2982_v6 = vmax.f32 %v1137_v3, %v1138_v4 }
 0x49d   : > { %v2984_v7 = vpop.f32.mrf.mxu0 }
 0x49f   : > { %v2986_v8 = vpop.f32.mrf.mxu0 }
 0x4a1   : > { %v2988_v9 = vpop.f32.mrf.mxu0 }
 0x4a3   : > { %v2990_v10 = vpop.f32.mrf.mxu0 }
 0x4a5   : > { %v2992_v11 = vpop.f32.mrf.mxu0 }
 0x4a6   : > { %v1144_v59 = vmax.f32 %v2992_v11, 0.0 }
 0x4a7   : > { %v2994_v12 = vpop.f32.mrf.mxu0 }
 0x4a9   : > { %v2996_v13 = vpop.f32.mrf.mxu0 }
 0x4aa   : > { %v1146_v11 = vmax.f32 %v2996_v13, 0.0  ;;  %v1141_v13 = vmax.f32 %v2986_v8, 0.0 }
 0x4ab   : > { %v2998_v14 = vpop.f32.mrf.mxu0 }
 0x4ac   : > { %v1147_v54 = vmax.f32 %v2998_v14, 0.0  ;;  %v1143_v14 = vmax.f32 %v2990_v10, 0.0  ;;  %v1145_v10 = vmax.f32 %v2994_v12, 0.0 }
 0x4ad   : > { %v3000_v15 = vpop.f32.mrf.mxu0 }
 0x4ae   : > { %v1148_v48 = vmax.f32 %v3000_v15, 0.0  ;;  %v1701_v12 = vpack.c.bf16 %v1143_v14, %v1141_v13 }
 0x4af   : > { %v3002_v16 = vpop.f32.mrf.mxu0 }
 0x4b0   : > { %v1186_v61 = vmax.f32 %v1147_v54, %v1148_v48 }
 0x4b1   : > { %v3004_v17 = vpop.f32.mrf.mxu0 }
 0x4b2   : > { %v1150_v15 = vmax.f32 %v3004_v17, 0.0  ;;  %v1139_v17 = vmax.f32 %v2976_v5, 0.0  ;;  %v1703_v5 = vpack.c.bf16 %v1147_v54, %v1145_v10 }
 0x4b3   : > { %v3006_v21 = vpop.f32.mrf.mxu0 }
 0x4b4   : > { %v1151_v46 = vmax.f32 %v3006_v21, 0.0  ;;  %v1699_v8 = vpack.c.bf16 %v1139_v17, %v1137_v3 }
 0x4b5   : > { %v3008_v22 = vpop.f32.mrf.mxu0 }
 0x4b6   : > { %v1152_v18 = vmax.f32 %v3008_v22, 0.0 }
 0x4b7   : > { %v3010_v24 = vpop.f32.mrf.mxu0 }
 0x4b8   : > { %v1192_v50 = vmax.f32 %v1151_v46, %v1152_v18  ;;  %v1153_v56 = vmax.f32 %v3010_v24, 0.0  ;;  %v1149_v24 = vmax.f32 %v3002_v16, 0.0 }
 0x4b9   : > { %v1106_v25 = vpop.f32.mrf.mxu0 }
 0x4ba   : > { %v1154_v52 = vmax.f32 %v1106_v25, 0.0 }
 0x4bb   : > { %v1108_v26 = vpop.f32.mrf.mxu0 }
 0x4bc   : > { %v1155_v39 = vmax.f32 %v1108_v26, 0.0  ;;  %v1195_v22 = vmax.f32 %v1153_v56, %v1154_v52  ;;  %v1140_v26 = vmax.f32 %v2984_v7, 0.0  ;;  %v1183_v7 = vmax.f32 %v1145_v10, %v1146_v11 }
 0x4bd   : > { %v1110_v27 = vpop.f32.mrf.mxu0 }
 0x4be   : > { %v1156_v20 = vmax.f32 %v1110_v27, 0.0  ;;  %v1180_v27 = vmax.f32 %v1143_v14, %v1144_v59  ;;  %v1174_v16 = vmax.f32 %v1139_v17, %v1140_v26 }
 0x4bf   : > { %v1114_v28 = vpop.f32.mrf.mxu0 }
 0x4c0   : > { %v1157_v31 = vmax.f32 %v1114_v28, 0.0  ;;  %v1198_v23 = vmax.f32 %v1155_v39, %v1156_v20  ;;  %v1708_v25 = vpack.c.bf16 %v1156_v20, %v1154_v52  ;;  %v1707_v28 = vpack.c.bf16 %v1155_v39, %v1153_v56 }
 0x4c1   : > { %v1116_v29 = vpop.f32.mrf.mxu0 }
 0x4c2   : > { %v1158_v42 = vmax.f32 %v1116_v29, 0.0  ;;  %v1189_v29 = vmax.f32 %v1149_v24, %v1150_v15 }
 0x4c3   : > { %v1118_v40 = vpop.f32.mrf.mxu0 }
 0x4c4   : > { %v1201_v38 = vmax.f32 %v1157_v31, %v1158_v42  ;;  %v1159_v32 = vmax.f32 %v1118_v40, 0.0  ;;  %v1705_v40 = vpack.c.bf16 %v1151_v46, %v1149_v24 }
 0x4c5   : > { %v1120_v34 = vpop.f32.mrf.mxu0 }
 0x4c6   : > { %v1160_v35 = vmax.f32 %v1120_v34, 0.0  ;;  %1202 = vmax.xlane.f32.xlu1 %v1201_v38  ;;  %v1709_v21 = vpack.c.bf16 %v1159_v32, %v1157_v31  ;;  %v1706_v31 = vpack.c.bf16 %v1152_v18, %v1150_v15  ;;  %v1704_v38 = vpack.c.bf16 %v1148_v48, %v1146_v11 }
 0x4c7   : > { %v1124_v19 = vpop.f32.mrf.mxu0 }
 0x4c8   : > { %v1204_v36 = vmax.f32 %v1159_v32, %v1160_v35  ;;  %v1161_v41 = vmax.f32 %v1124_v19, 0.0  ;;  %v1710_v55 = vpack.c.bf16 %v1160_v35, %v1158_v42  ;;  %v1142_v42 = vmax.f32 %v2988_v9, 0.0 }
 0x4c9   : > { %v1126_v37 = vpop.f32.mrf.mxu0  ;;  %v1700_v9 = vpack.c.bf16 %v1140_v26, %v1138_v4 }
 0x4ca   : > { %v1162_v43 = vmax.f32 %v1126_v37, 0.0  ;;  %1205 = vmax.xlane.f32.xlu1 %v1204_v36  ;;  %v1177_v34 = vmax.f32 %v1141_v13, %v1142_v42  ;;  %v1702_v32 = vpack.c.bf16 %v1144_v59, %v1142_v42 }
 0x4cb   : > { %v1128_v44 = vpop.f32.mrf.mxu0 }
 0x4cc   : > { %v1207_v30 = vmax.f32 %v1161_v41, %v1162_v43  ;;  %v1163_v33 = vmax.f32 %v1128_v44, 0.0 }
 0x4cd   : > { %v1130_v45 = vpop.f32.mrf.mxu0 }
 0x4ce   : > { %v1164_v47 = vmax.f32 %v1130_v45, 0.0  ;;  %1199 = vmax.xlane.f32.xlu1 %v1198_v23  ;;  %1208 = vmax.xlane.f32.xlu0 %v1207_v30  ;;  %v1711_v53 = vpack.c.bf16 %v1163_v33, %v1161_v41 }
 0x4cf   : > { %v1400_v3 = vpop.f32.mrf.mxu0 }
 0x4d0   : > { %v1712_v49 = vpack.c.bf16 %v1164_v47, %v1162_v43  ;;  %v1210_v51 = vmax.f32 %v1163_v33, %v1164_v47 }
 0x4d1   : > { %v1402_v35 = vpop.f32.mrf.mxu0 }
 0x4d2   : > { %1193 = vmax.xlane.f32.xlu1 %v1192_v50  ;;  %1737 = vmatprep.subr.bf16.mxu1 %v1712_v49 }
 0x4d3   : > { %1211 = vmax.xlane.f32.xlu0 %v1210_v51  ;;  %1738 = vmatpush1.bf16.msra.mxu1 %v1711_v53  ;;  %v1404_v36 = vpop.f32.mrf.mxu0 }
 0x4d4   : > { %1739 = vmatprep.subr.bf16.mxu1 %v1710_v55 }
 0x4d5   : > { %v1406_v41 = vpop.f32.mrf.mxu0 }
 0x4d6   : > { %1187 = vmax.xlane.f32.xlu1 %v1186_v61 }
 0x4d7   : > { %1196 = vmax.xlane.f32.xlu0 %v1195_v22  ;;  %1740 = vmatpush1.bf16.msra.mxu1 %v1709_v21 }
 0x4d8   : > { %1741 = vmatprep.subr.bf16.mxu1 %v1708_v25 }
 0x4da   : > { %1181 = vmax.xlane.f32.xlu1 %v1180_v27 }
 0x4db   : > { %1190 = vmax.xlane.f32.xlu0 %v1189_v29  ;;  %1742 = vmatpush1.bf16.msra.mxu1 %v1707_v28 }
 0x4dc   : > { %1743 = vmatprep.subr.bf16.mxu1 %v1706_v31 }
 0x4de   : > { %1175 = vmax.xlane.f32.xlu1 %v1174_v16 }
 0x4df   : > { %1184 = vmax.xlane.f32.xlu0 %v1183_v7  ;;  %1744 = vmatpush1.bf16.msra.mxu1 %v1705_v40 }
 0x4e0   : > { %1745 = vmatprep.subr.bf16.mxu1 %v1704_v38 }
 0x4e2   : > { %1169 = vmax.xlane.f32.xlu1 %v2969_v0  ;;  %v2526_v0 = vld [vmem:[%s3228_s10] sm:$0xff]  }
 0x4e3   : > { %1178 = vmax.xlane.f32.xlu0 %v1177_v34  ;;  %1746 = vmatpush1.bf16.msra.mxu1 %v1703_v5 }
 0x4e4   : > { %1747 = vmatprep.subr.bf16.mxu1 %v1702_v32 }
 0x4e7   : > { %1172 = vmax.xlane.f32.xlu0 %v2982_v6  ;;  %1748 = vmatpush1.bf16.msra.mxu1 %v1701_v12 }
 0x4e8   : > { %1749 = vmatprep.subr.bf16.mxu1 %v1700_v9 }
 0x4e9   : > { %v1410_v15 = vpop.f32.mrf.mxu0 }
 0x4eb   : > { %1166 = vmax.xlane.f32.xlu0 %v2958_v57  ;;  %1750 = vmatpush1.bf16.msra.mxu1 %v1699_v8  ;;  %v2533_v57 = vld [vmem:[%s3229_s11] sm:$0xff]   ;;  %v1412_v22 = vpop.f32.mrf.mxu0 }
 0x4ec   : > { %1751 = vmatprep.subr.bf16.mxu1 %v2967_v63  ;;  %2438 = vmatprep.mubr.bf16.mxu0 %v2533_v57  ;;  %v1295_v63 = vpop.f32.mrf.mxu1 }
 0x4ed   : > { %v1401_v4 = vadd.f32 %v1400_v3, %v1295_v63  ;;  %v1414_v25 = vpop.f32.mrf.mxu0 }
 0x4ee   : > { %v1297_v6 = vpop.f32.mrf.mxu1 }
 0x4ef   : > { %1752 = vmatpush1.bf16.msra.mxu1 %v2963_v60  ;;  %v2532_v60 = vld [vmem:[%s3228_s10 + $0x18] sm:$0xff]   ;;  %v1403_v19 = vadd.f32 %v1402_v35, %v1297_v6  ;;  %v1416_v26 = vpop.f32.mrf.mxu0 }
 0x4f0   : > { %v1299_v20 = vpop.f32.mrf.mxu1 }
 0x4f1   : > { %v1405_v37 = vadd.f32 %v1404_v36, %v1299_v20  ;;  %v1420_v11 = vpop.f32.mrf.mxu0 }
 0x4f2   : > { %1770 = vmatmul.mubr.bf16.vlgmr.msra.gmra.mxu1 %v2526_v0  ;;  %v1301_v39 = vpop.f32.mrf.mxu1 }
 0x4f3   : > { %1779 = vmatprep.mubr.bf16.mxu1 %v2606_v2  ;;  %v1407_v43 = vadd.f32 %v1406_v41, %v1301_v39  ;;  %v1422_v29 = vpop.f32.mrf.mxu0 }
 0x4f4   : > { %v1305_v44 = vpop.f32.mrf.mxu1 }
 0x4f5   : > { %v1411_v21 = vadd.f32 %v1410_v15, %v1305_v44  ;;  %v1424_v31 = vpop.f32.mrf.mxu0 }
 0x4f6   : > { %v1307_v18 = vpop.f32.mrf.mxu1 }
 0x4f7   : > { %v1413_v14 = vadd.f32 %v1412_v22, %v1307_v18  ;;  %v1426_v42 = vpop.f32.mrf.mxu0 }
 0x4f8   : > { %v1309_v23 = vpop.f32.mrf.mxu1 }
 0x4f9   : > { %v1415_v24 = vadd.f32 %v1414_v25, %v1309_v23  ;;  %v1430_v7 = vpop.f32.mrf.mxu0 }
 0x4fa   : > { %1780 = vmatmul.mubr.bf16.gmra.mxu1 %v2528_v1  ;;  %v1311_v30 = vpop.f32.mrf.mxu1 }
 0x4fb   : > { %1789 = vmatprep.mubr.bf16.mxu1 %v2606_v2  ;;  %v1417_v27 = vadd.f32 %v1416_v26, %v1311_v30  ;;  %v3066_v5 = vpop.f32.mrf.mxu0 }
 0x4fc   : > { %v1315_v33 = vpop.f32.mrf.mxu1 }
 0x4fd   : > { %v1421_v28 = vadd.f32 %v1420_v11, %v1315_v33  ;;  %v3068_v34 = vpop.f32.mrf.mxu0 }
 0x4fe   : > { %v1317_v45 = vpop.f32.mrf.mxu1 }
 0x4ff   : > { %v1423_v17 = vadd.f32 %v1422_v29, %v1317_v45  ;;  %v3070_v12 = vpop.f32.mrf.mxu0 }
 0x500   : > { %v1319_v46 = vpop.f32.mrf.mxu1 }
 0x501   : > { %v1425_v16 = vadd.f32 %v1424_v31, %v1319_v46  ;;  %v1634_v9 = vpop.f32.mrf.mxu0 }
 0x502   : > { %1790 = vmatmul.mubr.bf16.gmra.mxu1 %v2530_v62  ;;  %v1321_v47 = vpop.f32.mrf.mxu1 }
 0x503   : > { %1799 = vmatprep.mubr.bf16.mxu1 %v2606_v2  ;;  %v1427_v40 = vadd.f32 %v1426_v42, %v1321_v47  ;;  %v1636_v1 = vpop.f32.mrf.mxu0 }
 0x504   : > { %v1325_v48 = vpop.f32.mrf.mxu1 }
 0x505   : > { %v3064_v13 = vadd.f32 %v1430_v7, %v1325_v48  ;;  %v1638_v62 = vpop.f32.mrf.mxu0 }
 0x506   : > { %v3058_v49 = vpop.f32.mrf.mxu1 }
 0x507   : > { %v1640_v6 = vpop.f32.mrf.mxu0 }
 0x508   : > { %v3060_v50 = vpop.f32.mrf.mxu1 }
 0x509   : > { %v1644_v20 = vpop.f32.mrf.mxu0 }
 0x50a   : > { %1800 = vmatmul.mubr.bf16.gmra.mxu1 %v2532_v60  ;;  %v3062_v51 = vpop.f32.mrf.mxu1 }
 0x50b   : > { %2084 = vmatprep.mubr.bf16.mxu1 %v2606_v2 }
 0x50c   : > { %v1513_v52 = vpop.f32.mrf.mxu1 }
 0x50d   : > { %v1552_v53 = vadd.f32 %v1513_v52, %v1401_v4 }
 0x50e   : > { %v1515_v54 = vpop.f32.mrf.mxu1 }
 0x50f   : > { %v1553_v55 = vadd.f32 %v1515_v54, %v1403_v19  ;;  %v3072_v0 = vadd.f32 %v1634_v9, %v1552_v53 }
 0x510   : > { %v1517_v56 = vpop.f32.mrf.mxu1 }
 0x511   : > { %v1554_v58 = vadd.f32 %v1517_v56, %v1405_v37  ;;  %v3074_v57 = vadd.f32 %v1636_v1, %v1553_v55 }
 0x512   : > { %v1519_v59 = vpop.f32.mrf.mxu1 }
 0x513   : > { %v1555_v61 = vadd.f32 %v1519_v59, %v1407_v43  ;;  %v3076_v3 = vadd.f32 %v1638_v62, %v1554_v58  ;;  %v1646_v43 = vpop.f32.mrf.mxu0 }
 0x514   : > { %v1523_v10 = vpop.f32.mrf.mxu1 }
 0x515   : > { %v1556_v60 = vadd.f32 %v1523_v10, %v1411_v21  ;;  %v3078_v19 = vadd.f32 %v1640_v6, %v1555_v61  ;;  %v1648_v23 = vpop.f32.mrf.mxu0  ;;  %v2536_v6 = vld [vmem:[%s3229_s11 + $0x18] sm:$0xff]  }
 0x516   : > { %v1525_v38 = vpop.f32.mrf.mxu1 }
 0x517   : > { %v1557_v35 = vadd.f32 %v1525_v38, %v1413_v14  ;;  %v3080_v39 = vadd.f32 %v1644_v20, %v1556_v60  ;;  %v1650_v48 = vpop.f32.mrf.mxu0  ;;  %v1433_v20 = vadd.f32 %v3066_v5, %v3058_v49 }
 0x518   : > { %v1527_v32 = vpop.f32.mrf.mxu1 }
 0x519   : > { %v1558_v36 = vadd.f32 %v1527_v32, %v1415_v24  ;;  %v3082_v44 = vadd.f32 %v1646_v43, %v1557_v35  ;;  %v1654_v54 = vpop.f32.mrf.mxu0 }
 0x51a   : > { %v1529_v8 = vpop.f32.mrf.mxu1 }
 0x51b   : > { %v1559_v18 = vadd.f32 %v1529_v8, %v1417_v27  ;;  %v3084_v30 = vadd.f32 %v1648_v23, %v1558_v36  ;;  %v1656_v61 = vpop.f32.mrf.mxu0 }
 0x51c   : > { %v1533_v63 = vpop.f32.mrf.mxu1 }
 0x51d   : > { %v1560_v45 = vadd.f32 %v1533_v63, %v1421_v28  ;;  %v3086_v53 = vadd.f32 %v1650_v48, %v1559_v18  ;;  %v1658_v25 = vpop.f32.mrf.mxu0  ;;  %v2534_v63 = vld [vmem:[%s3229_s11 + $0x8] sm:$0xff]  }
 0x51e   : > { %v1535_v37 = vpop.f32.mrf.mxu1 }
 0x51f   : > { %v1561_v52 = vadd.f32 %v1535_v37, %v1423_v17  ;;  %v3088_v58 = vadd.f32 %v1654_v54, %v1560_v45  ;;  %v1660_v11 = vpop.f32.mrf.mxu0 }
 0x520   : > { %v1537_v46 = vpop.f32.mrf.mxu1 }
 0x521   : > { %v1562_v55 = vadd.f32 %v1537_v46, %v1425_v16  ;;  %v3090_v22 = vadd.f32 %v1656_v61, %v1561_v52 }
 0x522   : > { %v1539_v56 = vpop.f32.mrf.mxu1 }
 0x523   : > { %v1563_v21 = vadd.f32 %v1539_v56, %v1427_v40  ;;  %v3092_v26 = vadd.f32 %v1658_v25, %v1562_v55 }
 0x524   : > { %v1543_v35 = vpop.f32.mrf.mxu1 }
 0x525   : > { %v3094_v28 = vadd.f32 %v1660_v11, %v1563_v21  ;;  %v1564_v37 = vadd.f32 %v1543_v35, %v3064_v13 }
 0x526   : > { %v1545_v36 = vpop.f32.mrf.mxu1 }
 0x527   : > { %v1565_v43 = vadd.f32 %v1545_v36, %v1433_v20 }
 0x528   : > { %v1547_v18 = vpop.f32.mrf.mxu1 }
 0x52a   : > { %v1549_v61 = vpop.f32.mrf.mxu1 }
 0x54f   : > { %v1203_v4 = vpop.xlane.xlu1 %1202 }
 0x553   : > { %v1206_v41 = vpop.xlane.xlu1 %1205 }
 0x554   : > { %v1840_v24 = vpack.c.bf16 %v1206_v41, %v1203_v4  ;;  %v2535_v4 = vld [vmem:[%s3229_s11 + $0x10] sm:$0xff]   ;;  %v1435_v41 = vadd.f32 %v3068_v34, %v3060_v50 }
 0x557   : > { %v1209_v33 = vpop.xlane.xlu0 %1208  ;;  %v1200_v47 = vpop.xlane.xlu1 %1199 }
 0x558   : > { %v1664_v23 = vpop.f32.mrf.mxu0 }
 0x559   : > { %v1685_v45 = vadd.f32 %v1664_v23, %v1564_v37 }
 0x55a   : > { %v1666_v46 = vpop.f32.mrf.mxu0 }
 0x55b   : > { %v1194_v14 = vpop.xlane.xlu1 %1193 }
 0x55c   : > { %v1212_v59 = vpop.xlane.xlu0 %1211  ;;  %v1668_v48 = vpop.f32.mrf.mxu0 }
 0x55d   : > { %v1841_v15 = vpack.c.bf16 %v1212_v59, %v1209_v33  ;;  %v1566_v33 = vadd.f32 %v1547_v18, %v1435_v41 }
 0x55e   : > { %v1670_v54 = vpop.f32.mrf.mxu0 }
 0x55f   : > { %2422 = vmatprep.subr.bf16.mxu0 %v1841_v15  ;;  %v1188_v17 = vpop.xlane.xlu1 %1187  ;;  %v1687_v52 = vadd.f32 %v1668_v48, %v1566_v33 }
 0x560   : > { %2423 = vmatpush3.bf16.msra.mxu0 %v1841_v15  ;;  %v1197_v27 = vpop.xlane.xlu0 %1196 }
 0x561   : > { %2424 = vmatprep.subr.bf16.mxu0 %v1840_v24  ;;  %v1839_v29 = vpack.c.bf16 %v1200_v47, %v1197_v27  ;;  %v1686_v47 = vadd.f32 %v1666_v46, %v1565_v43 }
 0x563   : > { %v1182_v42 = vpop.xlane.xlu1 %1181 }
 0x564   : > { %2425 = vmatpush3.bf16.msra.mxu0 %v1840_v24  ;;  %v1191_v31 = vpop.xlane.xlu0 %1190 }
 0x565   : > { %2426 = vmatprep.subr.bf16.mxu0 %v1839_v29  ;;  %v1838_v10 = vpack.c.bf16 %v1194_v14, %v1191_v31 }
 0x567   : > { %v1176_v32 = vpop.xlane.xlu1 %1175 }
 0x568   : > { %2427 = vmatpush3.bf16.msra.mxu0 %v1839_v29  ;;  %v1185_v16 = vpop.xlane.xlu0 %1184 }
 0x569   : > { %2428 = vmatprep.subr.bf16.mxu0 %v1838_v10  ;;  %v1837_v40 = vpack.c.bf16 %v1188_v17, %v1185_v16 }
 0x56b   : > { %v1170_v62 = vpop.xlane.xlu1 %1169 }
 0x56c   : > { %2429 = vmatpush3.bf16.msra.mxu0 %v1838_v10  ;;  %v1179_v7 = vpop.xlane.xlu0 %1178 }
 0x56d   : > { %2430 = vmatprep.subr.bf16.mxu0 %v1837_v40  ;;  %v1836_v38 = vpack.c.bf16 %v1182_v42, %v1179_v7  ;;  %v1437_v7 = vadd.f32 %v3070_v12, %v3062_v51 }
 0x570   : > { %2431 = vmatpush3.bf16.msra.mxu0 %v1837_v40  ;;  %v1173_v9 = vpop.xlane.xlu0 %1172 }
 0x571   : > { %2432 = vmatprep.subr.bf16.mxu0 %v1836_v38  ;;  %v1835_v8 = vpack.c.bf16 %v1176_v32, %v1173_v9 }
 0x574   : > { %2433 = vmatpush3.bf16.msra.mxu0 %v1836_v38  ;;  %v1167_v1 = vpop.xlane.xlu0 %1166 }
 0x575   : > { %2434 = vmatprep.subr.bf16.mxu0 %v1835_v8  ;;  %v1834_v60 = vpack.c.bf16 %v1170_v62, %v1167_v1 }
 0x578   : > { %2435 = vmatpush3.bf16.msra.mxu0 %v1835_v8 }
 0x579   : > { %2436 = vmatprep.subr.bf16.mxu0 %v1834_v60 }
 0x57c   : > { %2437 = vmatpush3.bf16.msra.mxu0 %v1834_v60 }
 0x57f   : > { %2439 = vmatmul.mubr.bf16.vlgmr.msra.gmra.mxu0 %v2534_v63 }
 0x580   : > { %2442 = vmatprep.mubr.bf16.mxu0 %v2535_v4  ;;  %v1567_v4 = vadd.f32 %v1549_v61, %v1437_v7 }
 0x582   : > { %v1688_v12 = vadd.f32 %v1670_v54, %v1567_v4 }
 0x587   : > { %2443 = vmatmul.mubr.bf16.gmra.mxu0 %v2536_v6 }
 0x588   : > { %2201 = vmatprep.mubr.bf16.mxu0 %v2606_v2 }
 0x5b2   : > { %v3111_v15 = vpop.f32.mrf.mxu1 }
 0x5b4   : > { %v3113_v21 = vpop.f32.mrf.mxu1 }
 0x5b6   : > { %v3115_v14 = vpop.f32.mrf.mxu1 }
 0x5b8   : > { %v3117_v25 = vpop.f32.mrf.mxu1 }
 0x5ba   : > { %v1781_v24 = vpop.f32.mrf.mxu1 }
 0x5bb   : > { %v1814_v38 = vadd.f32 %v1781_v24, %v3080_v39 }
 0x5bc   : > { %v1783_v27 = vpop.f32.mrf.mxu1 }
 0x5bd   : > { %v1815_v32 = vadd.f32 %v1783_v27, %v3082_v44 }
 0x5be   : > { %v1785_v11 = vpop.f32.mrf.mxu1 }
 0x5bf   : > { %v1816_v8 = vadd.f32 %v1785_v11, %v3084_v30 }
 0x5c0   : > { %v1787_v29 = vpop.f32.mrf.mxu1 }
 0x5c1   : > { %v1817_v1 = vadd.f32 %v1787_v29, %v3086_v53 }
 0x5c2   : > { %v1791_v17 = vpop.f32.mrf.mxu1 }
 0x5c4   : > { %v1793_v31 = vpop.f32.mrf.mxu1 }
 0x5c6   : > { %v1795_v10 = vpop.f32.mrf.mxu1 }
 0x5c7   : > { %v1820_v54 = vadd.f32 %v1795_v10, %v3092_v26  ;;  %v1811_v10 = vadd.f32 %v3113_v21, %v3074_v57 }
 0x5c8   : > { %v1797_v16 = vpop.f32.mrf.mxu1 }
 0x5ca   : > { %v1801_v42 = vpop.f32.mrf.mxu1 }
 0x5cb   : > { %v1822_v18 = vadd.f32 %v1801_v42, %v1685_v45 }
 0x5cc   : > { %v1803_v9 = vpop.f32.mrf.mxu1 }
 0x5cd   : > { %v1823_v23 = vadd.f32 %v1803_v9, %v1686_v47 }
 0x5ce   : > { %v1805_v20 = vpop.f32.mrf.mxu1 }
 0x5cf   : > { %v1824_v48 = vadd.f32 %v1805_v20, %v1687_v52 }
 0x5d0   : > { %v1807_v30 = vpop.f32.mrf.mxu1 }
 0x63f   : > { %v2440_v55 = vpop.f32.mrf.mxu0 }
 0x640   : > { %1943 = vperm.xlu1 %2490, %v2440_v55   ;;  %v1825_v55 = vadd.f32 %v1807_v30, %v1688_v12 }
 0x641   : > { %v1900_v56 = vpop.f32.mrf.mxu0 }
 0x643   : > { %v2441_v49 = vpop.f32.mrf.mxu0 }
 0x644   : > { %1948 = vperm.xlu1 %2490, %v2441_v49   ;;  %v1818_v49 = vadd.f32 %v1791_v17, %v3088_v58 }
 0x645   : > { %v1903_v5 = vpop.f32.mrf.mxu0 }
 0x647   : > { %v2444_v13 = vpop.f32.mrf.mxu0 }
 0x648   : > { %1963 = vperm.xlu0 %2489, %v2444_v13  }
 0x649   : > { %v1916_v59 = vpop.f32.mrf.mxu0 }
 0x64a   : > { %1953 = vperm.xlu1 %2490, %v1916_v59  }
 0x64b   : > { %v2445_v50 = vpop.f32.mrf.mxu0 }
 0x64d   : > { %v1919_v34 = vpop.f32.mrf.mxu0 }
 0x64e   : > { %1968 = vperm.xlu1 %2490, %v2445_v50   ;;  %v1821_v50 = vadd.f32 %v1797_v16, %v3094_v28  ;;  %v1810_v28 = vadd.f32 %v3111_v15, %v3072_v0 }
 0x652   : > { %1958 = vperm.xlu1 %2490, %v1919_v34  }
 0x656   : > { %1933 = vperm.xlu1 %2490, %v1900_v56  }
 0x65a   : > { %1938 = vperm.xlu1 %2490, %v1903_v5   ;;  %v1819_v5 = vadd.f32 %v1793_v31, %v3090_v22 }
 0x6bb   : > { %v1944_v40 = vpop.permute.xlu1 %1943 }
 0x6bc   : > { %v1975_v62 = vadd.f32 %v1944_v40, %v1814_v38  ;;  %v1976_v60 = vadd.f32 %v1944_v40, %v1815_v32  ;;  %v1812_v38 = vadd.f32 %v3115_v14, %v3076_v3  ;;  %v1813_v32 = vadd.f32 %v3117_v25, %v3078_v19  ;;  %v2537_v3 = vld [vmem:[%s3230_s12] sm:$0xff]   ;;  %v2538_v19 = vld [vmem:[%s3230_s12 + $0x8] sm:$0xff]   ;;  %v2539_v14 = vld [vmem:[%s3230_s12 + $0x10] sm:$0xff]  }
 0x6bd   : > { %v2540_v25 = vld [vmem:[%s3230_s12 + $0x18] sm:$0xff]  }
 0x6be   : > { %v1991_v36 = vmax.f32 %v1975_v62, 0.0  ;;  %v1992_v37 = vmax.f32 %v1976_v60, 0.0 }
 0x6bf   : > { %v1949_v63 = vpop.permute.xlu1 %1948 }
 0x6c0   : > { %v1977_v6 = vadd.f32 %v1949_v63, %v1816_v8  ;;  %v1978_v35 = vadd.f32 %v1949_v63, %v1817_v1 }
 0x6c2   : > { %v1993_v41 = vmax.f32 %v1977_v6, 0.0  ;;  %v1994_v51 = vmax.f32 %v1978_v35, 0.0 }
 0x6c3   : > { %v1964_v43 = vpop.permute.xlu0 %1963 }
 0x6c4   : > { %v2013_v39 = vpack.c.bf16 %v1993_v41, %v1991_v36  ;;  %v2014_v44 = vpack.c.bf16 %v1994_v51, %v1992_v37  ;;  %v1983_v53 = vadd.f32 %v1964_v43, %v1822_v18  ;;  %v1984_v46 = vadd.f32 %v1964_v43, %v1823_v23 }
 0x6c5   : > { %v1954_v33 = vpop.permute.xlu1 %1953 }
 0x6c6   : > { %v1999_v34 = vmax.f32 %v1983_v53, 0.0  ;;  %v2000_v45 = vmax.f32 %v1984_v46, 0.0  ;;  %v1979_v47 = vadd.f32 %v1954_v33, %v1818_v49  ;;  %v1980_v61 = vadd.f32 %v1954_v33, %v1819_v5 }
 0x6c8   : > { %v1995_v58 = vmax.f32 %v1979_v47, 0.0  ;;  %v1996_v17 = vmax.f32 %v1980_v61, 0.0 }
 0x6c9   : > { %v1969_v56 = vpop.permute.xlu1 %1968 }
 0x6ca   : > { %v1985_v13 = vadd.f32 %v1969_v56, %v1824_v48  ;;  %v1986_v59 = vadd.f32 %v1969_v56, %v1825_v55 }
 0x6cc   : > { %v2001_v24 = vmax.f32 %v1985_v13, 0.0  ;;  %v2002_v27 = vmax.f32 %v1986_v59, 0.0 }
 0x6cd   : > { %v1959_v11 = vpop.permute.xlu1 %1958 }
 0x6ce   : > { %v2017_v52 = vpack.c.bf16 %v2001_v24, %v1999_v34  ;;  %v1981_v29 = vadd.f32 %v1959_v11, %v1820_v54  ;;  %v1982_v42 = vadd.f32 %v1959_v11, %v1821_v50  ;;  %v2018_v40 = vpack.c.bf16 %v2002_v27, %v2000_v45 }
 0x6d0   : > { %v1997_v22 = vmax.f32 %v1981_v29, 0.0  ;;  %v1998_v31 = vmax.f32 %v1982_v42, 0.0  ;;  %2060 = vmatprep.subr.bf16.mxu1 %v2018_v40 }
 0x6d1   : > { %2061 = vmatpush1.bf16.msra.mxu1 %v2017_v52  ;;  %v1934_v26 = vpop.permute.xlu1 %1933 }
 0x6d2   : > { %v2015_v16 = vpack.c.bf16 %v1997_v22, %v1995_v58  ;;  %v2016_v7 = vpack.c.bf16 %v1998_v31, %v1996_v17  ;;  %v1971_v9 = vadd.f32 %v1934_v26, %v1810_v28  ;;  %v1972_v8 = vadd.f32 %v1934_v26, %v1811_v10  ;;  %v2541_v31 = vld [vmem:[%s3231_s13] sm:$0xff]   ;;  %v2542_v26 = vld [vmem:[%s3231_s13 + $0x8] sm:$0xff]  }
 0x6d4   : > { %2062 = vmatprep.subr.bf16.mxu1 %v2016_v7  ;;  %v1987_v0 = vmax.f32 %v1971_v9, 0.0  ;;  %v1988_v15 = vmax.f32 %v1972_v8, 0.0 }
 0x6d5   : > { %2063 = vmatpush1.bf16.msra.mxu1 %v2015_v16  ;;  %v1939_v1 = vpop.permute.xlu1 %1938 }
 0x6d6   : > { %v1973_v62 = vadd.f32 %v1939_v1, %v1812_v38  ;;  %v1974_v60 = vadd.f32 %v1939_v1, %v1813_v32  ;;  %2064 = vmatprep.subr.bf16.mxu1 %v2014_v44 }
 0x6d8   : > { %v1989_v63 = vmax.f32 %v1973_v62, 0.0  ;;  %v1990_v57 = vmax.f32 %v1974_v60, 0.0 }
 0x6d9   : > { %2065 = vmatpush1.bf16.msra.mxu1 %v2013_v39 }
 0x6da   : > { %v2011_v21 = vpack.c.bf16 %v1989_v63, %v1987_v0  ;;  %v2012_v4 = vpack.c.bf16 %v1990_v57, %v1988_v15 }
 0x6dc   : > { %2066 = vmatprep.subr.bf16.mxu1 %v2012_v4 }
 0x6dd   : > { %2067 = vmatpush1.bf16.msra.mxu1 %v2011_v21 }
 0x6e0   : > { %2395 = vmatmul.mubr.msk.bf16.vlgmr.msra.gmra.mxu1 %vm2039_vm5, %v2537_v3 }
 0x6e1   : > { %2094 = vmatprep.mubr.bf16.mxu1 %v2606_v2 }
 0x6e8   : > { %2396 = vmatmul.mubr.msk.bf16.gmra.mxu1 %vm2039_vm5, %v2538_v19 }
 0x6e9   : > { %2104 = vmatprep.mubr.bf16.mxu1 %v2606_v2 }
 0x6f0   : > { %2397 = vmatmul.mubr.msk.bf16.gmra.mxu1 %vm2039_vm5, %v2539_v14 }
 0x6f1   : > { %2114 = vmatprep.mubr.bf16.mxu1 %v2606_v2 }
 0x6f8   : > { %2398 = vmatmul.mubr.msk.bf16.gmra.mxu1 %vm2039_vm5, %v2540_v25 }
 0x7a0   : > { %v2086_v6 = vpop.f32.mrf.mxu1 }
 0x7a1   : > { %v2125_v17 = vmax.f32 %v2086_v6, 0.0 }
 0x7a2   : > { %v2088_v35 = vpop.f32.mrf.mxu1 }
 0x7a3   : > { %v2126_v29 = vmax.f32 %v2088_v35, 0.0 }
 0x7a4   : > { %v2090_v20 = vpop.f32.mrf.mxu1 }
 0x7a5   : > { %v2127_v42 = vmax.f32 %v2090_v20, 0.0 }
 0x7a6   : > { %v2092_v36 = vpop.f32.mrf.mxu1 }
 0x7a7   : > { %v2128_v27 = vmax.f32 %v2092_v36, 0.0  ;;  %v2145_v22 = vpack.c.bf16 %v2127_v42, %v2125_v17 }
 0x7a8   : > { %v2096_v37 = vpop.f32.mrf.mxu1 }
 0x7a9   : > { %v2129_v52 = vmax.f32 %v2096_v37, 0.0  ;;  %v2146_v58 = vpack.c.bf16 %v2128_v27, %v2126_v29 }
 0x7aa   : > { %v2098_v41 = vpop.f32.mrf.mxu1 }
 0x7ab   : > { %v2130_v47 = vmax.f32 %v2098_v41, 0.0 }
 0x7ac   : > { %v2100_v51 = vpop.f32.mrf.mxu1 }
 0x7ad   : > { %v2131_v61 = vmax.f32 %v2100_v51, 0.0 }
 0x7ae   : > { %v2102_v12 = vpop.f32.mrf.mxu1 }
 0x7af   : > { %v2132_v50 = vmax.f32 %v2102_v12, 0.0  ;;  %v2147_v40 = vpack.c.bf16 %v2131_v61, %v2129_v52 }
 0x7b0   : > { %v2106_v39 = vpop.f32.mrf.mxu1 }
 0x7b1   : > { %v2133_v45 = vmax.f32 %v2106_v39, 0.0  ;;  %v2148_v11 = vpack.c.bf16 %v2132_v50, %v2130_v47 }
 0x7b2   : > { %v2108_v43 = vpop.f32.mrf.mxu1 }
 0x7b3   : > { %v2134_v5 = vmax.f32 %v2108_v43, 0.0 }
 0x7b4   : > { %v2110_v44 = vpop.f32.mrf.mxu1 }
 0x7b5   : > { %v2135_v59 = vmax.f32 %v2110_v44, 0.0 }
 0x7b6   : > { %v2112_v18 = vpop.f32.mrf.mxu1 }
 0x7b7   : > { %v2136_v48 = vmax.f32 %v2112_v18, 0.0  ;;  %v2149_v24 = vpack.c.bf16 %v2135_v59, %v2133_v45 }
 0x7b8   : > { %v2116_v23 = vpop.f32.mrf.mxu1 }
 0x7b9   : > { %v2137_v49 = vmax.f32 %v2116_v23, 0.0  ;;  %v2150_v34 = vpack.c.bf16 %v2136_v48, %v2134_v5 }
 0x7ba   : > { %v2118_v30 = vpop.f32.mrf.mxu1 }
 0x7bb   : > { %v2138_v55 = vmax.f32 %v2118_v30, 0.0 }
 0x7bc   : > { %v2120_v33 = vpop.f32.mrf.mxu1 }
 0x7bd   : > { %v2139_v53 = vmax.f32 %v2120_v33, 0.0 }
 0x7be   : > { %v2122_v46 = vpop.f32.mrf.mxu1 }
 0x7bf   : > { %v2140_v56 = vmax.f32 %v2122_v46, 0.0  ;;  %v2151_v54 = vpack.c.bf16 %v2139_v53, %v2137_v49 }
 0x7c1   : > { %v2152_v13 = vpack.c.bf16 %v2140_v56, %v2138_v55 }
 0x7c3   : > { %2177 = vmatprep.subr.bf16.mxu0 %v2152_v13 }
 0x7c4   : > { %2178 = vmatpush1.bf16.msra.mxu0 %v2151_v54 }
 0x7c5   : > { %2179 = vmatprep.subr.bf16.mxu0 %v2150_v34 }
 0x7c8   : > { %2180 = vmatpush1.bf16.msra.mxu0 %v2149_v24 }
 0x7c9   : > { %2181 = vmatprep.subr.bf16.mxu0 %v2148_v11 }
 0x7cc   : > { %2182 = vmatpush1.bf16.msra.mxu0 %v2147_v40 }
 0x7cd   : > { %2183 = vmatprep.subr.bf16.mxu0 %v2146_v58 }
 0x7d0   : > { %2184 = vmatpush1.bf16.msra.mxu0 %v2145_v22 }
 0x7d3   : > { %2401 = vmatmul.mubr.msk.bf16.vlgmr.msra.gmra.mxu0 %vm2039_vm5, %v2541_v31 }
 0x7d4   : > { %2211 = vmatprep.mubr.bf16.mxu0 %v2606_v2 }
 0x7db   : > { %2402 = vmatmul.mubr.msk.bf16.gmra.mxu0 %vm2039_vm5, %v2542_v26 }
 0x893   : > { %v2203_v28 = vpop.f32.mrf.mxu0 }
 0x894   : > { %v2222_v10 = vmax.f32 %v2203_v28, 0.0 }
 0x895   : > { %v2205_v16 = vpop.f32.mrf.mxu0 }
 0x896   : > { %2230 = vst [vmem:[%s460_s18] sm:$0xff] %v2222_v10  ;;  %v2223_v7 = vmax.f32 %v2205_v16, 0.0 }
 0x897   : > { %v2207_v38 = vpop.f32.mrf.mxu0 }
 0x898   : > { %2231 = vst [vmem:[%s460_s18 + $0x8] sm:$0xff] %v2223_v7  ;;  %v2224_v32 = vmax.f32 %v2207_v38, 0.0 }
 0x899   : > { %v2209_v2 = vpop.f32.mrf.mxu0 }
 0x89a   : > { %2232 = vst [vmem:[%s460_s18 + $0x10] sm:$0xff] %v2224_v32  ;;  %v2225_v9 = vmax.f32 %v2209_v2, 0.0 }
 0x89b   : > { %v2213_v8 = vpop.f32.mrf.mxu0 }
 0x89c   : > { %2233 = vst [vmem:[%s460_s18 + $0x18] sm:$0xff] %v2225_v9  ;;  %v2226_v1 = vmax.f32 %v2213_v8, 0.0 }
 0x89d   : > { %v2215_v62 = vpop.f32.mrf.mxu0 }
 0x89e   : > { %2234 = vst [vmem:[%s460_s18 + $0x20] sm:$0xff] %v2226_v1  ;;  %v2227_v60 = vmax.f32 %v2215_v62, 0.0 }
 0x89f   : > { %v2217_v0 = vpop.f32.mrf.mxu0 }
 0x8a0   : > { %2235 = vst [vmem:[%s460_s18 + $0x28] sm:$0xff] %v2227_v60  ;;  %v2228_v15 = vmax.f32 %v2217_v0, 0.0 }
 0x8a1   : > { %v2219_v63 = vpop.f32.mrf.mxu0 }
 0x8a2   : > { %2236 = vst [vmem:[%s460_s18 + $0x30] sm:$0xff] %v2228_v15  ;;  %v2229_v57 = vmax.f32 %v2219_v63, 0.0 }
 0x8a4   : > { %2237 = vst [vmem:[%s460_s18 + $0x38] sm:$0xff] %v2229_v57 }
 0x8a5   : > { %2556 = shalt.err (!%p2553_p3)
}
 0x8a6   : > { %s2557_s0 = scalar_lea.hbm %s3172_s27, 1024  ;;  %s2561_s1 = scalar_lea.hbm %s3232_s14, 2048 }
 0x8a7   : > { %p2558_p4 = scmp.ne.s32.totalorder %s3172_s27, %s2557_s0  ;;  %p2562_p9 = scmp.lt.s32.totalorder %s3172_s27, %s3232_s14 }
 0x8a8   : > { %p2563_p10 = scmp.lt.s32.totalorder %s2561_s1, %s2557_s0 }
 0x8a9   : > { %p2559_p7 = pnand %p2558_p4, %p2723_p5 }
 0x8aa   : > { %p2564_p11 = por %p2563_p10, %p2562_p9 }
 0x8ab   : > { %p2560_p8 = pneg %p2559_p7 }
 0x8ad   : > { %p2565_p12 = pnand %p2564_p11, %p2560_p8 }
 0x8af   : > { %2568 = shalt.err (!%p2565_p12)
}
 0x8b0   : > { %s2608_s28 = smov 256   ;;  %s2609_s25 = smov 16  }
 0x8b1   : > { %2446 = dma.vmem_to_hbm [thread:$0]  (%p2723_p5), %s3174_s21, 1024, %s3172_s27, %s3178_s17, %s2608_s28, %s2608_s28, %s2609_s25  }
 0x8b2 PF: > { %p2452_p13 = scmp.ge.s32.totalorder %s2603_s16, 2  ;;  %s2267_s20 = sand.u32 1, %s2591_s29  }
 0x8b3   : > { %s2268_s2 = scalar_lea.sflag [#allocation3], %s2267_s20 }
 0x8b4   : > { %p2449_p0 = pnand %p2452_p13, %p2727_p6 }
 0x8b6   : > { %p2450_p1 = pneg %p2449_p0 }
 0x8b8   : > { %2586 = dma.done.wait (%p2450_p1), %s2268_s2, 1024  }
 0x8b9   : > { %2588 = vsyncadd (%p2450_p1), %s2268_s2, 4294966272  ;;  %p24_p2 = scmp.ge.s32.totalorder %s2710_s19, 4   ;;  %s3243_s29 = smov %s2595_s30 }
 0x8ba   : > { %s3244_s30 = smov %s2599_s15  ;;  %s3245_s15 = smov %s2721_s22 }
 0x8bb   : > { %s3246_s16 = smov %s2710_s19  ;;  %26 = sbr.rel (!%p24_p2) target bundleno = 8 (0x8), region = 111 }
 0x8c0   :  { %2273 = vsyncpa [#allocation3], 1 }
 0x8c1   :  { %2275 = vsyncpa [#allocation3 + $0x1], 1 }

</bundles_post_ra>
